<compile_context>
chip_gen: v7x
topology: tpu7x:2x2x1
jax: 0.10.0
libtpu: 0.0.40
codegen_flags: <defaults>
</compile_context>

<pallas_src>
import functools

import jax
import jax.numpy as jnp
from jax.experimental import pallas as pl
from jax.experimental.pallas import tpu as pltpu

# ---------------- config (small synthetic BERT, structure identical to the module) ----------------
VOCAB = 100
TYPE_VOCAB = 2
MAX_POS = 32
HIDDEN = 32            # bert hidden_size (768 in the real model)
N_HEADS = 2
HEAD_DIM = HIDDEN // N_HEADS
INTER = 64             # bert intermediate size
N_LAYERS = 2
LSTM_HIDDEN = 16       # module uses 64; scaled down
NUM_CLASSES = 3
LN_EPS = 1e-12

_CP = pltpu.CompilerParams(dimension_semantics=("arbitrary",))


def _full_spec(shape):
    nd = len(shape)
    return pl.BlockSpec(shape, lambda i, _nd=nd: (0,) * _nd)


def _sigmoid(x):
    return 1.0 / (1.0 + jnp.exp(-x))


def _ln(x, g, b):
    mu = jnp.mean(x, axis=-1, keepdims=True)
    var = jnp.mean((x - mu) ** 2, axis=-1, keepdims=True)
    return (x - mu) * jax.lax.rsqrt(var + LN_EPS) * g + b


def _bf16(x):
    return x.astype(jnp.bfloat16)


# ---------------- kernel 1: embedding add + layernorm ----------------
def _emb_ln_kernel(x_ref, g_ref, b_ref, o_ref):
    o_ref[...] = _ln(x_ref[...], g_ref[...], b_ref[...])


def embed_layernorm(x, g, b):
    M, H = x.shape
    return pl.pallas_call(
        _emb_ln_kernel,
        grid=(1,),
        out_shape=jax.ShapeDtypeStruct((M, H), jnp.float32),
        in_specs=[_full_spec((M, H)), _full_spec((1, H)), _full_spec((1, H))],
        out_specs=_full_spec((M, H)),
        compiler_params=_CP,
    )(x, g, b)


# ---------------- kernel 2: fused BERT encoder layer ----------------
def _bert_layer_kernel(x_ref, mask_ref,
                       wqkv_ref, bqkv_ref, wo_ref, bo_ref, ln1_g_ref, ln1_b_ref,
                       wi_ref, bi_ref, wo2_ref, bo2_ref, ln2_g_ref, ln2_b_ref,
                       o_ref, *, B, S):
    x = x_ref[...]                                                     # (B*S, H) f32

    # fused Q|K|V projection: one MXU op, 3*H-wide (lane-denser) output
    qkv = jnp.dot(_bf16(x), wqkv_ref[...],
                  preferred_element_type=jnp.float32) + bqkv_ref[...]  # (B*S, 3H)
    qkv3 = qkv.reshape(B, S, 3 * HIDDEN)
    mask = mask_ref[...]                                               # (B, 1, S) additive

    scale = 1.0 / (HEAD_DIM ** 0.5)
    ctx_heads = []
    for h in range(N_HEADS):                                           # N_HEADS is tiny & static
        lo = h * HEAD_DIM
        q = qkv3[:, :, 0 * HIDDEN + lo: 0 * HIDDEN + lo + HEAD_DIM]    # (B, S, D)
        k = qkv3[:, :, 1 * HIDDEN + lo: 1 * HIDDEN + lo + HEAD_DIM]
        v = qkv3[:, :, 2 * HIDDEN + lo: 2 * HIDDEN + lo + HEAD_DIM]
        s = jnp.einsum("bqd,bkd->bqk", _bf16(q), _bf16(k),
                       preferred_element_type=jnp.float32) * scale + mask
        m = jnp.max(s, axis=-1, keepdims=True)                         # softmax stats in f32
        e = jnp.exp(s - m)
        p = e / jnp.sum(e, axis=-1, keepdims=True)
        ctx_heads.append(jnp.einsum("bqk,bkd->bqd", _bf16(p), _bf16(v),
                                    preferred_element_type=jnp.float32))
    ctx = jnp.concatenate(ctx_heads, axis=-1).reshape(B * S, HIDDEN)

    attn_out = jnp.dot(_bf16(ctx), wo_ref[...],
                       preferred_element_type=jnp.float32) + bo_ref[...]
    x1 = _ln(attn_out + x, ln1_g_ref[...], ln1_b_ref[...])

    inter = jnp.dot(_bf16(x1), wi_ref[...],
                    preferred_element_type=jnp.float32) + bi_ref[...]
    # TODO(synk): HF BERT uses exact erf-gelu; tanh-approximate gelu used for safe lowering.
    inter = jax.nn.gelu(inter, approximate=True)
    ffn = jnp.dot(_bf16(inter), wo2_ref[...],
                  preferred_element_type=jnp.float32) + bo2_ref[...]
    o_ref[...] = _ln(ffn + x1, ln2_g_ref[...], ln2_b_ref[...])


def bert_layer(x, add_mask, p, B, S):
    M = B * S
    kernel = functools.partial(_bert_layer_kernel, B=B, S=S)
    return pl.pallas_call(
        kernel,
        grid=(1,),
        out_shape=jax.ShapeDtypeStruct((M, HIDDEN), jnp.float32),
        in_specs=[_full_spec((M, HIDDEN)), _full_spec((B, 1, S)),
                  _full_spec((HIDDEN, 3 * HIDDEN)), _full_spec((1, 3 * HIDDEN)),
                  _full_spec((HIDDEN, HIDDEN)), _full_spec((1, HIDDEN)),
                  _full_spec((1, HIDDEN)), _full_spec((1, HIDDEN)),
                  _full_spec((HIDDEN, INTER)), _full_spec((1, INTER)),
                  _full_spec((INTER, HIDDEN)), _full_spec((1, HIDDEN)),
                  _full_spec((1, HIDDEN)), _full_spec((1, HIDDEN))],
        out_specs=_full_spec((M, HIDDEN)),
        compiler_params=_CP,
    )(x, add_mask, p["wqkv"], p["bqkv"], p["wo"], p["bo"], p["ln1_g"], p["ln1_b"],
      p["wi"], p["bi"], p["wo2"], p["bo2"], p["ln2_g"], p["ln2_b"])


# ---------------- kernel 3: fused BiLSTM -> GAP/GMP -> dropout(identity) -> linear ----------------
def _bilstm_head_kernel(x_ref, wih_ref, whh_f_ref, bf_ref, whh_r_ref, br_ref,
                        cls_w_ref, cls_b_ref, o_ref, fwd_sc, bwd_sc, *, T, N):
    G = 4 * LSTM_HIDDEN

    # Hoisted input projection for BOTH directions: one (T*N, H) @ (H, 2G) MXU op.
    xin = x_ref[...].reshape(T * N, HIDDEN)
    xproj = jnp.dot(_bf16(xin), wih_ref[...],
                    preferred_element_type=jnp.float32).reshape(T, N, 2 * G)

    def cell(gin, h, c, whh, b):
        # b holds b_ih + b_hh (PyTorch nn.LSTM has two biases; exported params must be their sum).
        g = gin + jnp.dot(_bf16(h), whh, preferred_element_type=jnp.float32) + b
        i = _sigmoid(g[:, 0 * LSTM_HIDDEN:1 * LSTM_HIDDEN])     # PyTorch gate order: i, f, g, o
        f = _sigmoid(g[:, 1 * LSTM_HIDDEN:2 * LSTM_HIDDEN])
        gg = jnp.tanh(g[:, 2 * LSTM_HIDDEN:3 * LSTM_HIDDEN])
        o = _sigmoid(g[:, 3 * LSTM_HIDDEN:4 * LSTM_HIDDEN])
        c_new = f * c + i * gg
        h_new = o * jnp.tanh(c_new)
        return h_new, c_new

    zeros = jnp.zeros((N, LSTM_HIDDEN), jnp.float32)

    h, c = zeros, zeros
    for t in range(T):                                  # T is tiny & static -> unrolled
        h, c = cell(xproj[t, :, :G], h, c, whh_f_ref[...], bf_ref[...])
        fwd_sc[t] = h                                   # write per step: no list accumulation

    h, c = zeros, zeros
    for t in range(T - 1, -1, -1):
        h, c = cell(xproj[t, :, G:], h, c, whh_r_ref[...], br_ref[...])
        bwd_sc[t] = h

    lstm_out = jnp.concatenate([fwd_sc[...], bwd_sc[...]], axis=-1)    # (T, N, 2*HID)
    gap = jnp.mean(lstm_out, axis=1)                                   # GAP over dim=1
    gmp = jnp.max(lstm_out, axis=1)                                    # GMP over dim=1
    feat = jnp.concatenate([gap, gmp], axis=-1)                        # (T, 4*HID)
    # dropout(p=0.3) is identity at inference
    o_ref[...] = jnp.dot(_bf16(feat), cls_w_ref[...],
                         preferred_element_type=jnp.float32) + cls_b_ref[...]


def bilstm_gap_gmp_linear(x, lstm_p, cls_w, cls_b):
    T, N, H = x.shape
    G = 4 * LSTM_HIDDEN
    kernel = functools.partial(_bilstm_head_kernel, T=T, N=N)
    return pl.pallas_call(
        kernel,
        grid=(1,),
        out_shape=jax.ShapeDtypeStruct((T, NUM_CLASSES), jnp.float32),
        in_specs=[_full_spec((T, N, H)),
                  _full_spec((H, 2 * G)),
                  _full_spec((LSTM_HIDDEN, G)), _full_spec((1, G)),
                  _full_spec((LSTM_HIDDEN, G)), _full_spec((1, G)),
                  _full_spec((4 * LSTM_HIDDEN, NUM_CLASSES)), _full_spec((1, NUM_CLASSES))],
        out_specs=_full_spec((T, NUM_CLASSES)),
        scratch_shapes=[pltpu.VMEM((T, N, LSTM_HIDDEN), jnp.float32),
                        pltpu.VMEM((T, N, LSTM_HIDDEN), jnp.float32)],
        compiler_params=_CP,
    )(x, lstm_p["w_ih"], lstm_p["w_hh_f"], lstm_p["b_f"],
      lstm_p["w_hh_r"], lstm_p["b_r"], cls_w, cls_b)


# ---------------- model glue ----------------
@jax.jit
def forward(params, input_ids, attention_mask, token_type_ids):
    B, S = input_ids.shape
    # BERT embeddings: gathers are plain-JAX glue; LN runs in a Pallas kernel.
    we = params["word_emb"][input_ids]                                  # (B, S, H)
    pe = params["pos_emb"][:S][None]                                    # (1, S, H)
    te = params["type_emb"][token_type_ids]                             # (B, S, H)
    x = embed_layernorm((we + pe + te).reshape(B * S, HIDDEN),
                        params["emb_ln_g"], params["emb_ln_b"])
    # additive attention mask (HF-style -1e4), shape (B, 1, S); broadcast per head inside the kernel
    add_mask = ((1.0 - attention_mask.astype(jnp.float32)) * -1e4)[:, None, :]
    # encoder layers: one fused pallas_call each
    for p in params["layers"]:
        x = bert_layer(x, add_mask, p, B, S)
    sequence_output = x.reshape(B, S, HIDDEN)
    # pooled_output is produced by BertModel but never used by the reference head -> dead work removed.
    # BiLSTM (time axis = BERT batch axis, batch_first=False quirk) + GAP/GMP + dropout + linear, fused.
    return bilstm_gap_gmp_linear(sequence_output, params["lstm"],
                                 params["cls_w"], params["cls_b"])


# ---------------- deterministic parameter init (weights stored in bf16, biases/LN in f32) ----------------
def init_params(key):
    cnt = [0]

    def nrm(shape, scale=0.02, dtype=jnp.float32):
        cnt[0] += 1
        v = scale * jax.random.normal(jax.random.fold_in(key, cnt[0]), shape, dtype=jnp.float32)
        return v.astype(dtype)

    def zeros(shape):
        return jnp.zeros(shape, jnp.float32)

    def ones(shape):
        return jnp.ones(shape, jnp.float32)

    bf16 = jnp.bfloat16
    layers = []
    for _ in range(N_LAYERS):
        layers.append(dict(
            wqkv=nrm((HIDDEN, 3 * HIDDEN), dtype=bf16), bqkv=zeros((1, 3 * HIDDEN)),
            wo=nrm((HIDDEN, HIDDEN), dtype=bf16), bo=zeros((1, HIDDEN)),
            ln1_g=ones((1, HIDDEN)), ln1_b=zeros((1, HIDDEN)),
            wi=nrm((HIDDEN, INTER), dtype=bf16), bi=zeros((1, INTER)),
            wo2=nrm((INTER, HIDDEN), dtype=bf16), bo2=zeros((1, HIDDEN)),
            ln2_g=ones((1, HIDDEN)), ln2_b=zeros((1, HIDDEN)),
        ))
    G = 4 * LSTM_HIDDEN
    lstm = dict(
        w_ih=nrm((HIDDEN, 2 * G), 0.1, bf16),                 # [w_ih_fwd | w_ih_rev] concatenated
        w_hh_f=nrm((LSTM_HIDDEN, G), 0.1, bf16), b_f=nrm((1, G), 0.1),   # b = b_ih + b_hh
        w_hh_r=nrm((LSTM_HIDDEN, G), 0.1, bf16), b_r=nrm((1, G), 0.1),
    )
    return dict(
        word_emb=nrm((VOCAB, HIDDEN)),
        pos_emb=nrm((MAX_POS, HIDDEN)),
        type_emb=nrm((TYPE_VOCAB, HIDDEN)),
        emb_ln_g=ones((1, HIDDEN)), emb_ln_b=zeros((1, HIDDEN)),
        layers=layers,
        lstm=lstm,
        cls_w=nrm((4 * LSTM_HIDDEN, NUM_CLASSES), 0.1, bf16),
        cls_b=zeros((1, NUM_CLASSES)),
    )


if __name__ == "__main__":
    key = jax.random.PRNGKey(0)
    B, S = 2, 8
    params = init_params(key)

    input_ids = jax.random.randint(jax.random.fold_in(key, 1000), (B, S), 0, VOCAB,
                                   dtype=jnp.int32)
    attention_mask = jnp.ones((B, S), jnp.int32)
    token_type_ids = jnp.concatenate(
        [jnp.zeros((B, S // 2), jnp.int32), jnp.ones((B, S - S // 2), jnp.int32)], axis=1)

    out = forward(params, input_ids, attention_mask, token_type_ids)
    jax.block_until_ready(out)
    assert out.shape == (B, NUM_CLASSES) and out.dtype == jnp.float32
    print("KERNEL_OK")
</pallas_src>

<mosaic_0001>
module attributes {stable_mosaic.version = 11 : i64} {
  func.func @_emb_ln_kernel(%arg0: i32, %arg1: memref<16x32xf32, #tpu.memory_space<vmem>>, %arg2: memref<1x32xf32, #tpu.memory_space<vmem>>, %arg3: memref<1x32xf32, #tpu.memory_space<vmem>>, %arg4: memref<16x32xf32, #tpu.memory_space<vmem>>) attributes {dimension_semantics = [#tpu.dimension_semantics<arbitrary>], iteration_bounds = array<i64: 1>, scalar_prefetch = 0 : i64, scratch_operands = 0 : i64, tpu.core_type = #tpu.core_type<tc>, window_params = [{pipeline_mode = #tpu.pipeline_mode<synchronous>, transform_indices = @transform_0, window_bounds = array<i64: 16, 32>}, {pipeline_mode = #tpu.pipeline_mode<synchronous>, transform_indices = @transform_1, window_bounds = array<i64: 1, 32>}, {pipeline_mode = #tpu.pipeline_mode<synchronous>, transform_indices = @transform_2, window_bounds = array<i64: 1, 32>}, {pipeline_mode = #tpu.pipeline_mode<synchronous>, transform_indices = @transform_3, window_bounds = array<i64: 16, 32>}]} {
    %c0 = arith.constant 0 : index
    %c0_0 = arith.constant 0 : index
    %0 = vector.load %arg1[%c0, %c0_0] : memref<16x32xf32, #tpu.memory_space<vmem>>, vector<16x32xf32>
    %c0_1 = arith.constant 0 : index
    %c0_2 = arith.constant 0 : index
    %1 = vector.load %arg2[%c0_1, %c0_2] : memref<1x32xf32, #tpu.memory_space<vmem>>, vector<1x32xf32>
    %c0_3 = arith.constant 0 : index
    %c0_4 = arith.constant 0 : index
    %2 = vector.load %arg3[%c0_3, %c0_4] : memref<1x32xf32, #tpu.memory_space<vmem>>, vector<1x32xf32>
    %cst = arith.constant dense<0.000000e+00> : vector<16xf32>
    %3 = vector.multi_reduction <add>, %0, %cst [1] : vector<16x32xf32> to vector<16xf32>
    %4 = vector.shape_cast %3 : vector<16xf32> to vector<16x1xf32>
    %cst_5 = arith.constant 3.200000e+01 : f32
    %5 = vector.broadcast %cst_5 : f32 to vector<16x1xf32>
    %6 = arith.divf %4, %5 : vector<16x1xf32>
    %7 = vector.broadcast %6 : vector<16x1xf32> to vector<16x32xf32>
    %8 = arith.subf %0, %7 : vector<16x32xf32>
    %9 = arith.mulf %8, %8 : vector<16x32xf32>
    %cst_6 = arith.constant dense<0.000000e+00> : vector<16xf32>
    %10 = vector.multi_reduction <add>, %9, %cst_6 [1] : vector<16x32xf32> to vector<16xf32>
    %11 = vector.shape_cast %10 : vector<16xf32> to vector<16x1xf32>
    %cst_7 = arith.constant 3.200000e+01 : f32
    %12 = vector.broadcast %cst_7 : f32 to vector<16x1xf32>
    %13 = arith.divf %11, %12 : vector<16x1xf32>
    %14 = vector.broadcast %6 : vector<16x1xf32> to vector<16x32xf32>
    %15 = arith.subf %0, %14 : vector<16x32xf32>
    %cst_8 = arith.constant 9.99999996E-13 : f32
    %16 = vector.broadcast %cst_8 : f32 to vector<16x1xf32>
    %17 = arith.addf %13, %16 : vector<16x1xf32>
    %18 = math.rsqrt %17 : vector<16x1xf32>
    %19 = vector.broadcast %18 : vector<16x1xf32> to vector<16x32xf32>
    %20 = arith.mulf %15, %19 : vector<16x32xf32>
    %21 = vector.broadcast %1 : vector<1x32xf32> to vector<16x32xf32>
    %22 = arith.mulf %20, %21 : vector<16x32xf32>
    %23 = vector.broadcast %2 : vector<1x32xf32> to vector<16x32xf32>
    %24 = arith.addf %22, %23 : vector<16x32xf32>
    %c0_9 = arith.constant 0 : index
    %c0_10 = arith.constant 0 : index
    %25 = vector.load %arg4[%c0_9, %c0_10] : memref<16x32xf32, #tpu.memory_space<vmem>>, vector<16x32xf32>
    tpu.vector_store %arg4[%c0_9, %c0_10], %24 {strides = array<i32>} : memref<16x32xf32, #tpu.memory_space<vmem>>, vector<16x32xf32>,
    return
  }
  func.func @transform_0(%arg0: i32) -> (i32, i32) {
    %c0_i32 = arith.constant 0 : i32
    %c0_i32_0 = arith.constant 0 : i32
    %c0_i32_1 = arith.constant 0 : i32
    return %c0_i32, %c0_i32_0 : i32, i32
  }
  func.func @transform_1(%arg0: i32) -> (i32, i32) {
    %c0_i32 = arith.constant 0 : i32
    %c0_i32_0 = arith.constant 0 : i32
    %c0_i32_1 = arith.constant 0 : i32
    return %c0_i32, %c0_i32_0 : i32, i32
  }
  func.func @transform_2(%arg0: i32) -> (i32, i32) {
    %c0_i32 = arith.constant 0 : i32
    %c0_i32_0 = arith.constant 0 : i32
    %c0_i32_1 = arith.constant 0 : i32
    return %c0_i32, %c0_i32_0 : i32, i32
  }
  func.func @transform_3(%arg0: i32) -> (i32, i32) {
    %c0_i32 = arith.constant 0 : i32
    %c0_i32_0 = arith.constant 0 : i32
    %c0_i32_1 = arith.constant 0 : i32
    return %c0_i32, %c0_i32_0 : i32, i32
  }
}

module attributes {stable_mosaic.version = 11 : i64} {
  func.func @_bert_layer_kernel(%arg0: i32, %arg1: memref<16x32xf32, #tpu.memory_space<vmem>>, %arg2: memref<2x1x8xf32, #tpu.memory_space<vmem>>, %arg3: memref<32x96xbf16, #tpu.memory_space<vmem>>, %arg4: memref<1x96xf32, #tpu.memory_space<vmem>>, %arg5: memref<32x32xbf16, #tpu.memory_space<vmem>>, %arg6: memref<1x32xf32, #tpu.memory_space<vmem>>, %arg7: memref<1x32xf32, #tpu.memory_space<vmem>>, %arg8: memref<1x32xf32, #tpu.memory_space<vmem>>, %arg9: memref<32x64xbf16, #tpu.memory_space<vmem>>, %arg10: memref<1x64xf32, #tpu.memory_space<vmem>>, %arg11: memref<64x32xbf16, #tpu.memory_space<vmem>>, %arg12: memref<1x32xf32, #tpu.memory_space<vmem>>, %arg13: memref<1x32xf32, #tpu.memory_space<vmem>>, %arg14: memref<1x32xf32, #tpu.memory_space<vmem>>, %arg15: memref<16x32xf32, #tpu.memory_space<vmem>>) attributes {dimension_semantics = [#tpu.dimension_semantics<arbitrary>], iteration_bounds = array<i64: 1>, scalar_prefetch = 0 : i64, scratch_operands = 0 : i64, tpu.core_type = #tpu.core_type<tc>, window_params = [{pipeline_mode = #tpu.pipeline_mode<synchronous>, transform_indices = @transform_0, window_bounds = array<i64: 16, 32>}, {pipeline_mode = #tpu.pipeline_mode<synchronous>, transform_indices = @transform_1, window_bounds = array<i64: 2, 1, 8>}, {pipeline_mode = #tpu.pipeline_mode<synchronous>, transform_indices = @transform_2, window_bounds = array<i64: 32, 96>}, {pipeline_mode = #tpu.pipeline_mode<synchronous>, transform_indices = @transform_3, window_bounds = array<i64: 1, 96>}, {pipeline_mode = #tpu.pipeline_mode<synchronous>, transform_indices = @transform_4, window_bounds = array<i64: 32, 32>}, {pipeline_mode = #tpu.pipeline_mode<synchronous>, transform_indices = @transform_5, window_bounds = array<i64: 1, 32>}, {pipeline_mode = #tpu.pipeline_mode<synchronous>, transform_indices = @transform_6, window_bounds = array<i64: 1, 32>}, {pipeline_mode = #tpu.pipeline_mode<synchronous>, transform_indices = @transform_7, window_bounds = array<i64: 1, 32>}, {pipeline_mode = #tpu.pipeline_mode<synchronous>, transform_indices = @transform_8, window_bounds = array<i64: 32, 64>}, {pipeline_mode = #tpu.pipeline_mode<synchronous>, transform_indices = @transform_9, window_bounds = array<i64: 1, 64>}, {pipeline_mode = #tpu.pipeline_mode<synchronous>, transform_indices = @transform_10, window_bounds = array<i64: 64, 32>}, {pipeline_mode = #tpu.pipeline_mode<synchronous>, transform_indices = @transform_11, window_bounds = array<i64: 1, 32>}, {pipeline_mode = #tpu.pipeline_mode<synchronous>, transform_indices = @transform_12, window_bounds = array<i64: 1, 32>}, {pipeline_mode = #tpu.pipeline_mode<synchronous>, transform_indices = @transform_13, window_bounds = array<i64: 1, 32>}, {pipeline_mode = #tpu.pipeline_mode<synchronous>, transform_indices = @transform_14, window_bounds = array<i64: 16, 32>}]} {
    %c0 = arith.constant 0 : index
    %c0_0 = arith.constant 0 : index
    %0 = vector.load %arg1[%c0, %c0_0] : memref<16x32xf32, #tpu.memory_space<vmem>>, vector<16x32xf32>
    %1 = arith.truncf %0 : vector<16x32xf32> to vector<16x32xbf16>
    %c0_1 = arith.constant 0 : index
    %c0_2 = arith.constant 0 : index
    %2 = vector.load %arg3[%c0_1, %c0_2] : memref<32x96xbf16, #tpu.memory_space<vmem>>, vector<32x96xbf16>
    %cst = arith.constant dense<0.000000e+00> : vector<16x96xf32>
    %3 = tpu.matmul %1, %2, %cst {dimension_numbers = #tpu.dot_dimension_numbers<[1], [0], [0], [1], [0, 0, 1, 1], [], []>} : vector<16x32xbf16>, vector<32x96xbf16>, vector<16x96xf32> -> vector<16x96xf32>
    %c0_3 = arith.constant 0 : index
    %c0_4 = arith.constant 0 : index
    %4 = vector.load %arg4[%c0_3, %c0_4] : memref<1x96xf32, #tpu.memory_space<vmem>>, vector<1x96xf32>
    %5 = vector.broadcast %4 : vector<1x96xf32> to vector<16x96xf32>
    %6 = arith.addf %3, %5 : vector<16x96xf32>
    %7 = vector.shape_cast %6 : vector<16x96xf32> to vector<2x8x96xf32>
    %c0_5 = arith.constant 0 : index
    %c0_6 = arith.constant 0 : index
    %c0_7 = arith.constant 0 : index
    %8 = vector.load %arg2[%c0_5, %c0_6, %c0_7] : memref<2x1x8xf32, #tpu.memory_space<vmem>>, vector<2x1x8xf32>
    %9 = vector.extract_strided_slice %7 {offsets = [0, 0, 0], sizes = [2, 8, 16], strides = [1, 1, 1]} : vector<2x8x96xf32> to vector<2x8x16xf32>
    %10 = vector.extract_strided_slice %7 {offsets = [0, 0, 32], sizes = [2, 8, 16], strides = [1, 1, 1]} : vector<2x8x96xf32> to vector<2x8x16xf32>
    %11 = vector.extract_strided_slice %7 {offsets = [0, 0, 64], sizes = [2, 8, 16], strides = [1, 1, 1]} : vector<2x8x96xf32> to vector<2x8x16xf32>
    %12 = arith.truncf %9 : vector<2x8x16xf32> to vector<2x8x16xbf16>
    %13 = arith.truncf %10 : vector<2x8x16xf32> to vector<2x8x16xbf16>
    "tpu.trace_start"() <{level = 10 : i32, message = "bqd,bkd->bqk"}> : () -> ()
    %cst_8 = arith.constant dense<0.000000e+00> : vector<2x8x8xf32>
    %14 = tpu.matmul %12, %13, %cst_8 {dimension_numbers = #tpu.dot_dimension_numbers<[2], [2], [1], [1], [0, 0, 0, 1, 1, 1], [0], [0]>} : vector<2x8x16xbf16>, vector<2x8x16xbf16>, vector<2x8x8xf32> -> vector<2x8x8xf32>
    "tpu.trace_stop"() : () -> ()
    %cst_9 = arith.constant 2.500000e-01 : f32
    %15 = vector.broadcast %cst_9 : f32 to vector<2x8x8xf32>
    %16 = arith.mulf %14, %15 : vector<2x8x8xf32>
    %17 = vector.broadcast %8 : vector<2x1x8xf32> to vector<2x8x8xf32>
    %18 = arith.addf %16, %17 : vector<2x8x8xf32>
    %cst_10 = arith.constant dense<0xFF800000> : vector<2x8xf32>
    %19 = vector.multi_reduction <maximumf>, %18, %cst_10 [2] : vector<2x8x8xf32> to vector<2x8xf32>
    %20 = vector.shape_cast %19 : vector<2x8xf32> to vector<2x8x1xf32>
    %21 = vector.broadcast %20 : vector<2x8x1xf32> to vector<2x8x8xf32>
    %22 = arith.subf %18, %21 : vector<2x8x8xf32>
    %23 = math.exp %22 : vector<2x8x8xf32>
    %cst_11 = arith.constant dense<0.000000e+00> : vector<2x8xf32>
    %24 = vector.multi_reduction <add>, %23, %cst_11 [2] : vector<2x8x8xf32> to vector<2x8xf32>
    %25 = vector.shape_cast %24 : vector<2x8xf32> to vector<2x8x1xf32>
    %26 = vector.broadcast %25 : vector<2x8x1xf32> to vector<2x8x8xf32>
    %27 = arith.divf %23, %26 : vector<2x8x8xf32>
    %28 = arith.truncf %27 : vector<2x8x8xf32> to vector<2x8x8xbf16>
    %29 = arith.truncf %11 : vector<2x8x16xf32> to vector<2x8x16xbf16>
    "tpu.trace_start"() <{level = 10 : i32, message = "bqk,bkd->bqd"}> : () -> ()
    %cst_12 = arith.constant dense<0.000000e+00> : vector<2x8x16xf32>
    %30 = tpu.matmul %28, %29, %cst_12 {dimension_numbers = #tpu.dot_dimension_numbers<[2], [1], [1], [2], [0, 0, 0, 1, 1, 2], [0], [0]>} : vector<2x8x8xbf16>, vector<2x8x16xbf16>, vector<2x8x16xf32> -> vector<2x8x16xf32>
    "tpu.trace_stop"() : () -> ()
    %31 = vector.extract_strided_slice %7 {offsets = [0, 0, 16], sizes = [2, 8, 16], strides = [1, 1, 1]} : vector<2x8x96xf32> to vector<2x8x16xf32>
    %32 = vector.extract_strided_slice %7 {offsets = [0, 0, 48], sizes = [2, 8, 16], strides = [1, 1, 1]} : vector<2x8x96xf32> to vector<2x8x16xf32>
    %33 = vector.extract_strided_slice %7 {offsets = [0, 0, 80], sizes = [2, 8, 16], strides = [1, 1, 1]} : vector<2x8x96xf32> to vector<2x8x16xf32>
    %34 = arith.truncf %31 : vector<2x8x16xf32> to vector<2x8x16xbf16>
    %35 = arith.truncf %32 : vector<2x8x16xf32> to vector<2x8x16xbf16>
    "tpu.trace_start"() <{level = 10 : i32, message = "bqd,bkd->bqk"}> : () -> ()
    %cst_13 = arith.constant dense<0.000000e+00> : vector<2x8x8xf32>
    %36 = tpu.matmul %34, %35, %cst_13 {dimension_numbers = #tpu.dot_dimension_numbers<[2], [2], [1], [1], [0, 0, 0, 1, 1, 1], [0], [0]>} : vector<2x8x16xbf16>, vector<2x8x16xbf16>, vector<2x8x8xf32> -> vector<2x8x8xf32>
    "tpu.trace_stop"() : () -> ()
    %cst_14 = arith.constant 2.500000e-01 : f32
    %37 = vector.broadcast %cst_14 : f32 to vector<2x8x8xf32>
    %38 = arith.mulf %36, %37 : vector<2x8x8xf32>
    %39 = vector.broadcast %8 : vector<2x1x8xf32> to vector<2x8x8xf32>
    %40 = arith.addf %38, %39 : vector<2x8x8xf32>
    %cst_15 = arith.constant dense<0xFF800000> : vector<2x8xf32>
    %41 = vector.multi_reduction <maximumf>, %40, %cst_15 [2] : vector<2x8x8xf32> to vector<2x8xf32>
    %42 = vector.shape_cast %41 : vector<2x8xf32> to vector<2x8x1xf32>
    %43 = vector.broadcast %42 : vector<2x8x1xf32> to vector<2x8x8xf32>
    %44 = arith.subf %40, %43 : vector<2x8x8xf32>
    %45 = math.exp %44 : vector<2x8x8xf32>
    %cst_16 = arith.constant dense<0.000000e+00> : vector<2x8xf32>
    %46 = vector.multi_reduction <add>, %45, %cst_16 [2] : vector<2x8x8xf32> to vector<2x8xf32>
    %47 = vector.shape_cast %46 : vector<2x8xf32> to vector<2x8x1xf32>
    %48 = vector.broadcast %47 : vector<2x8x1xf32> to vector<2x8x8xf32>
    %49 = arith.divf %45, %48 : vector<2x8x8xf32>
    %50 = arith.truncf %49 : vector<2x8x8xf32> to vector<2x8x8xbf16>
    %51 = arith.truncf %33 : vector<2x8x16xf32> to vector<2x8x16xbf16>
    "tpu.trace_start"() <{level = 10 : i32, message = "bqk,bkd->bqd"}> : () -> ()
    %cst_17 = arith.constant dense<0.000000e+00> : vector<2x8x16xf32>
    %52 = tpu.matmul %50, %51, %cst_17 {dimension_numbers = #tpu.dot_dimension_numbers<[2], [1], [1], [2], [0, 0, 0, 1, 1, 2], [0], [0]>} : vector<2x8x8xbf16>, vector<2x8x16xbf16>, vector<2x8x16xf32> -> vector<2x8x16xf32>
    "tpu.trace_stop"() : () -> ()
    %53 = tpu.concatenate %30, %52 in 2 : vector<2x8x16xf32>, vector<2x8x16xf32> -> vector<2x8x32xf32>
    %54 = vector.shape_cast %53 : vector<2x8x32xf32> to vector<16x32xf32>
    %55 = arith.truncf %54 : vector<16x32xf32> to vector<16x32xbf16>
    %c0_18 = arith.constant 0 : index
    %c0_19 = arith.constant 0 : index
    %56 = vector.load %arg5[%c0_18, %c0_19] : memref<32x32xbf16, #tpu.memory_space<vmem>>, vector<32x32xbf16>
    %cst_20 = arith.constant dense<0.000000e+00> : vector<16x32xf32>
    %57 = tpu.matmul %55, %56, %cst_20 {dimension_numbers = #tpu.dot_dimension_numbers<[1], [0], [0], [1], [0, 0, 1, 1], [], []>} : vector<16x32xbf16>, vector<32x32xbf16>, vector<16x32xf32> -> vector<16x32xf32>
    %c0_21 = arith.constant 0 : index
    %c0_22 = arith.constant 0 : index
    %58 = vector.load %arg6[%c0_21, %c0_22] : memref<1x32xf32, #tpu.memory_space<vmem>>, vector<1x32xf32>
    %59 = vector.broadcast %58 : vector<1x32xf32> to vector<16x32xf32>
    %60 = arith.addf %57, %59 : vector<16x32xf32>
    %61 = arith.addf %60, %0 : vector<16x32xf32>
    %c0_23 = arith.constant 0 : index
    %c0_24 = arith.constant 0 : index
    %62 = vector.load %arg7[%c0_23, %c0_24] : memref<1x32xf32, #tpu.memory_space<vmem>>, vector<1x32xf32>
    %c0_25 = arith.constant 0 : index
    %c0_26 = arith.constant 0 : index
    %63 = vector.load %arg8[%c0_25, %c0_26] : memref<1x32xf32, #tpu.memory_space<vmem>>, vector<1x32xf32>
    %cst_27 = arith.constant dense<0.000000e+00> : vector<16xf32>
    %64 = vector.multi_reduction <add>, %61, %cst_27 [1] : vector<16x32xf32> to vector<16xf32>
    %65 = vector.shape_cast %64 : vector<16xf32> to vector<16x1xf32>
    %cst_28 = arith.constant 3.200000e+01 : f32
    %66 = vector.broadcast %cst_28 : f32 to vector<16x1xf32>
    %67 = arith.divf %65, %66 : vector<16x1xf32>
    %68 = vector.broadcast %67 : vector<16x1xf32> to vector<16x32xf32>
    %69 = arith.subf %61, %68 : vector<16x32xf32>
    %70 = arith.mulf %69, %69 : vector<16x32xf32>
    %cst_29 = arith.constant dense<0.000000e+00> : vector<16xf32>
    %71 = vector.multi_reduction <add>, %70, %cst_29 [1] : vector<16x32xf32> to vector<16xf32>
    %72 = vector.shape_cast %71 : vector<16xf32> to vector<16x1xf32>
    %cst_30 = arith.constant 3.200000e+01 : f32
    %73 = vector.broadcast %cst_30 : f32 to vector<16x1xf32>
    %74 = arith.divf %72, %73 : vector<16x1xf32>
    %75 = vector.broadcast %67 : vector<16x1xf32> to vector<16x32xf32>
    %76 = arith.subf %61, %75 : vector<16x32xf32>
    %cst_31 = arith.constant 9.99999996E-13 : f32
    %77 = vector.broadcast %cst_31 : f32 to vector<16x1xf32>
    %78 = arith.addf %74, %77 : vector<16x1xf32>
    %79 = math.rsqrt %78 : vector<16x1xf32>
    %80 = vector.broadcast %79 : vector<16x1xf32> to vector<16x32xf32>
    %81 = arith.mulf %76, %80 : vector<16x32xf32>
    %82 = vector.broadcast %62 : vector<1x32xf32> to vector<16x32xf32>
    %83 = arith.mulf %81, %82 : vector<16x32xf32>
    %84 = vector.broadcast %63 : vector<1x32xf32> to vector<16x32xf32>
    %85 = arith.addf %83, %84 : vector<16x32xf32>
    %86 = arith.truncf %85 : vector<16x32xf32> to vector<16x32xbf16>
    %c0_32 = arith.constant 0 : index
    %c0_33 = arith.constant 0 : index
    %87 = vector.load %arg9[%c0_32, %c0_33] : memref<32x64xbf16, #tpu.memory_space<vmem>>, vector<32x64xbf16>
    %cst_34 = arith.constant dense<0.000000e+00> : vector<16x64xf32>
    %88 = tpu.matmul %86, %87, %cst_34 {dimension_numbers = #tpu.dot_dimension_numbers<[1], [0], [0], [1], [0, 0, 1, 1], [], []>} : vector<16x32xbf16>, vector<32x64xbf16>, vector<16x64xf32> -> vector<16x64xf32>
    %c0_35 = arith.constant 0 : index
    %c0_36 = arith.constant 0 : index
    %89 = vector.load %arg10[%c0_35, %c0_36] : memref<1x64xf32, #tpu.memory_space<vmem>>, vector<1x64xf32>
    %90 = vector.broadcast %89 : vector<1x64xf32> to vector<16x64xf32>
    %91 = arith.addf %88, %90 : vector<16x64xf32>
    %92 = arith.mulf %91, %91 : vector<16x64xf32>
    %93 = arith.mulf %91, %92 : vector<16x64xf32>
    %cst_37 = arith.constant 4.471500e-02 : f32
    %94 = vector.broadcast %cst_37 : f32 to vector<16x64xf32>
    %95 = arith.mulf %94, %93 : vector<16x64xf32>
    %96 = arith.addf %91, %95 : vector<16x64xf32>
    %cst_38 = arith.constant 0.797884583 : f32
    %97 = vector.broadcast %cst_38 : f32 to vector<16x64xf32>
    %98 = arith.mulf %97, %96 : vector<16x64xf32>
    %99 = math.tanh %98 : vector<16x64xf32>
    %cst_39 = arith.constant 1.000000e+00 : f32
    %100 = vector.broadcast %cst_39 : f32 to vector<16x64xf32>
    %101 = arith.addf %100, %99 : vector<16x64xf32>
    %cst_40 = arith.constant 5.000000e-01 : f32
    %102 = vector.broadcast %cst_40 : f32 to vector<16x64xf32>
    %103 = arith.mulf %102, %101 : vector<16x64xf32>
    %104 = arith.mulf %91, %103 : vector<16x64xf32>
    %105 = arith.truncf %104 : vector<16x64xf32> to vector<16x64xbf16>
    %c0_41 = arith.constant 0 : index
    %c0_42 = arith.constant 0 : index
    %106 = vector.load %arg11[%c0_41, %c0_42] : memref<64x32xbf16, #tpu.memory_space<vmem>>, vector<64x32xbf16>
    %cst_43 = arith.constant dense<0.000000e+00> : vector<16x32xf32>
    %107 = tpu.matmul %105, %106, %cst_43 {dimension_numbers = #tpu.dot_dimension_numbers<[1], [0], [0], [1], [0, 0, 1, 1], [], []>} : vector<16x64xbf16>, vector<64x32xbf16>, vector<16x32xf32> -> vector<16x32xf32>
    %c0_44 = arith.constant 0 : index
    %c0_45 = arith.constant 0 : index
    %108 = vector.load %arg12[%c0_44, %c0_45] : memref<1x32xf32, #tpu.memory_space<vmem>>, vector<1x32xf32>
    %109 = vector.broadcast %108 : vector<1x32xf32> to vector<16x32xf32>
    %110 = arith.addf %107, %109 : vector<16x32xf32>
    %111 = arith.addf %110, %85 : vector<16x32xf32>
    %c0_46 = arith.constant 0 : index
    %c0_47 = arith.constant 0 : index
    %112 = vector.load %arg13[%c0_46, %c0_47] : memref<1x32xf32, #tpu.memory_space<vmem>>, vector<1x32xf32>
    %c0_48 = arith.constant 0 : index
    %c0_49 = arith.constant 0 : index
    %113 = vector.load %arg14[%c0_48, %c0_49] : memref<1x32xf32, #tpu.memory_space<vmem>>, vector<1x32xf32>
    %cst_50 = arith.constant dense<0.000000e+00> : vector<16xf32>
    %114 = vector.multi_reduction <add>, %111, %cst_50 [1] : vector<16x32xf32> to vector<16xf32>
    %115 = vector.shape_cast %114 : vector<16xf32> to vector<16x1xf32>
    %cst_51 = arith.constant 3.200000e+01 : f32
    %116 = vector.broadcast %cst_51 : f32 to vector<16x1xf32>
    %117 = arith.divf %115, %116 : vector<16x1xf32>
    %118 = vector.broadcast %117 : vector<16x1xf32> to vector<16x32xf32>
    %119 = arith.subf %111, %118 : vector<16x32xf32>
    %120 = arith.mulf %119, %119 : vector<16x32xf32>
    %cst_52 = arith.constant dense<0.000000e+00> : vector<16xf32>
    %121 = vector.multi_reduction <add>, %120, %cst_52 [1] : vector<16x32xf32> to vector<16xf32>
    %122 = vector.shape_cast %121 : vector<16xf32> to vector<16x1xf32>
    %cst_53 = arith.constant 3.200000e+01 : f32
    %123 = vector.broadcast %cst_53 : f32 to vector<16x1xf32>
    %124 = arith.divf %122, %123 : vector<16x1xf32>
    %125 = vector.broadcast %117 : vector<16x1xf32> to vector<16x32xf32>
    %126 = arith.subf %111, %125 : vector<16x32xf32>
    %cst_54 = arith.constant 9.99999996E-13 : f32
    %127 = vector.broadcast %cst_54 : f32 to vector<16x1xf32>
    %128 = arith.addf %124, %127 : vector<16x1xf32>
    %129 = math.rsqrt %128 : vector<16x1xf32>
    %130 = vector.broadcast %129 : vector<16x1xf32> to vector<16x32xf32>
    %131 = arith.mulf %126, %130 : vector<16x32xf32>
    %132 = vector.broadcast %112 : vector<1x32xf32> to vector<16x32xf32>
    %133 = arith.mulf %131, %132 : vector<16x32xf32>
    %134 = vector.broadcast %113 : vector<1x32xf32> to vector<16x32xf32>
    %135 = arith.addf %133, %134 : vector<16x32xf32>
    %c0_55 = arith.constant 0 : index
    %c0_56 = arith.constant 0 : index
    %136 = vector.load %arg15[%c0_55, %c0_56] : memref<16x32xf32, #tpu.memory_space<vmem>>, vector<16x32xf32>
    tpu.vector_store %arg15[%c0_55, %c0_56], %135 {strides = array<i32>} : memref<16x32xf32, #tpu.memory_space<vmem>>, vector<16x32xf32>,
    return
  }
  func.func @transform_0(%arg0: i32) -> (i32, i32) {
    %c0_i32 = arith.constant 0 : i32
    %c0_i32_0 = arith.constant 0 : i32
    %c0_i32_1 = arith.constant 0 : i32
    return %c0_i32, %c0_i32_0 : i32, i32
  }
  func.func @transform_1(%arg0: i32) -> (i32, i32, i32) {
    %c0_i32 = arith.constant 0 : i32
    %c0_i32_0 = arith.constant 0 : i32
    %c0_i32_1 = arith.constant 0 : i32
    %c0_i32_2 = arith.constant 0 : i32
    return %c0_i32, %c0_i32_0, %c0_i32_1 : i32, i32, i32
  }
  func.func @transform_2(%arg0: i32) -> (i32, i32) {
    %c0_i32 = arith.constant 0 : i32
    %c0_i32_0 = arith.constant 0 : i32
    %c0_i32_1 = arith.constant 0 : i32
    return %c0_i32, %c0_i32_0 : i32, i32
  }
  func.func @transform_3(%arg0: i32) -> (i32, i32) {
    %c0_i32 = arith.constant 0 : i32
    %c0_i32_0 = arith.constant 0 : i32
    %c0_i32_1 = arith.constant 0 : i32
    return %c0_i32, %c0_i32_0 : i32, i32
  }
  func.func @transform_4(%arg0: i32) -> (i32, i32) {
    %c0_i32 = arith.constant 0 : i32
    %c0_i32_0 = arith.constant 0 : i32
    %c0_i32_1 = arith.constant 0 : i32
    return %c0_i32, %c0_i32_0 : i32, i32
  }
  func.func @transform_5(%arg0: i32) -> (i32, i32) {
    %c0_i32 = arith.constant 0 : i32
    %c0_i32_0 = arith.constant 0 : i32
    %c0_i32_1 = arith.constant 0 : i32
    return %c0_i32, %c0_i32_0 : i32, i32
  }
  func.func @transform_6(%arg0: i32) -> (i32, i32) {
    %c0_i32 = arith.constant 0 : i32
    %c0_i32_0 = arith.constant 0 : i32
    %c0_i32_1 = arith.constant 0 : i32
    return %c0_i32, %c0_i32_0 : i32, i32
  }
  func.func @transform_7(%arg0: i32) -> (i32, i32) {
    %c0_i32 = arith.constant 0 : i32
    %c0_i32_0 = arith.constant 0 : i32
    %c0_i32_1 = arith.constant 0 : i32
    return %c0_i32, %c0_i32_0 : i32, i32
  }
  func.func @transform_8(%arg0: i32) -> (i32, i32) {
    %c0_i32 = arith.constant 0 : i32
    %c0_i32_0 = arith.constant 0 : i32
    %c0_i32_1 = arith.constant 0 : i32
    return %c0_i32, %c0_i32_0 : i32, i32
  }
  func.func @transform_9(%arg0: i32) -> (i32, i32) {
    %c0_i32 = arith.constant 0 : i32
    %c0_i32_0 = arith.constant 0 : i32
    %c0_i32_1 = arith.constant 0 : i32
    return %c0_i32, %c0_i32_0 : i32, i32
  }
  func.func @transform_10(%arg0: i32) -> (i32, i32) {
    %c0_i32 = arith.constant 0 : i32
    %c0_i32_0 = arith.constant 0 : i32
    %c0_i32_1 = arith.constant 0 : i32
    return %c0_i32, %c0_i32_0 : i32, i32
  }
  func.func @transform_11(%arg0: i32) -> (i32, i32) {
    %c0_i32 = arith.constant 0 : i32
    %c0_i32_0 = arith.constant 0 : i32
    %c0_i32_1 = arith.constant 0 : i32
    return %c0_i32, %c0_i32_0 : i32, i32
  }
  func.func @transform_12(%arg0: i32) -> (i32, i32) {
    %c0_i32 = arith.constant 0 : i32
    %c0_i32_0 = arith.constant 0 : i32
    %c0_i32_1 = arith.constant 0 : i32
    return %c0_i32, %c0_i32_0 : i32, i32
  }
  func.func @transform_13(%arg0: i32) -> (i32, i32) {
    %c0_i32 = arith.constant 0 : i32
    %c0_i32_0 = arith.constant 0 : i32
    %c0_i32_1 = arith.constant 0 : i32
    return %c0_i32, %c0_i32_0 : i32, i32
  }
  func.func @transform_14(%arg0: i32) -> (i32, i32) {
    %c0_i32 = arith.constant 0 : i32
    %c0_i32_0 = arith.constant 0 : i32
    %c0_i32_1 = arith.constant 0 : i32
    return %c0_i32, %c0_i32_0 : i32, i32
  }
}

module attributes {stable_mosaic.version = 11 : i64} {
  func.func @_bilstm_head_kernel(%arg0: i32, %arg1: memref<2x8x32xf32, #tpu.memory_space<vmem>>, %arg2: memref<32x128xbf16, #tpu.memory_space<vmem>>, %arg3: memref<16x64xbf16, #tpu.memory_space<vmem>>, %arg4: memref<1x64xf32, #tpu.memory_space<vmem>>, %arg5: memref<16x64xbf16, #tpu.memory_space<vmem>>, %arg6: memref<1x64xf32, #tpu.memory_space<vmem>>, %arg7: memref<64x3xbf16, #tpu.memory_space<vmem>>, %arg8: memref<1x3xf32, #tpu.memory_space<vmem>>, %arg9: memref<2x3xf32, #tpu.memory_space<vmem>>, %arg10: memref<2x8x16xf32, #tpu.memory_space<vmem>>, %arg11: memref<2x8x16xf32, #tpu.memory_space<vmem>>) attributes {dimension_semantics = [#tpu.dimension_semantics<arbitrary>], iteration_bounds = array<i64: 1>, scalar_prefetch = 0 : i64, scratch_operands = 2 : i64, tpu.core_type = #tpu.core_type<tc>, window_params = [{pipeline_mode = #tpu.pipeline_mode<synchronous>, transform_indices = @transform_0, window_bounds = array<i64: 2, 8, 32>}, {pipeline_mode = #tpu.pipeline_mode<synchronous>, transform_indices = @transform_1, window_bounds = array<i64: 32, 128>}, {pipeline_mode = #tpu.pipeline_mode<synchronous>, transform_indices = @transform_2, window_bounds = array<i64: 16, 64>}, {pipeline_mode = #tpu.pipeline_mode<synchronous>, transform_indices = @transform_3, window_bounds = array<i64: 1, 64>}, {pipeline_mode = #tpu.pipeline_mode<synchronous>, transform_indices = @transform_4, window_bounds = array<i64: 16, 64>}, {pipeline_mode = #tpu.pipeline_mode<synchronous>, transform_indices = @transform_5, window_bounds = array<i64: 1, 64>}, {pipeline_mode = #tpu.pipeline_mode<synchronous>, transform_indices = @transform_6, window_bounds = array<i64: 64, 3>}, {pipeline_mode = #tpu.pipeline_mode<synchronous>, transform_indices = @transform_7, window_bounds = array<i64: 1, 3>}, {pipeline_mode = #tpu.pipeline_mode<synchronous>, transform_indices = @transform_8, window_bounds = array<i64: 2, 3>}]} {
    %c0 = arith.constant 0 : index
    %c0_0 = arith.constant 0 : index
    %c0_1 = arith.constant 0 : index
    %0 = vector.load %arg1[%c0, %c0_0, %c0_1] : memref<2x8x32xf32, #tpu.memory_space<vmem>>, vector<2x8x32xf32>
    %1 = vector.shape_cast %0 : vector<2x8x32xf32> to vector<16x32xf32>
    %2 = arith.truncf %1 : vector<16x32xf32> to vector<16x32xbf16>
    %c0_2 = arith.constant 0 : index
    %c0_3 = arith.constant 0 : index
    %3 = vector.load %arg2[%c0_2, %c0_3] : memref<32x128xbf16, #tpu.memory_space<vmem>>, vector<32x128xbf16>
    %cst = arith.constant dense<0.000000e+00> : vector<16x128xf32>
    %4 = tpu.matmul %2, %3, %cst {dimension_numbers = #tpu.dot_dimension_numbers<[1], [0], [0], [1], [0, 0, 1, 1], [], []>} : vector<16x32xbf16>, vector<32x128xbf16>, vector<16x128xf32> -> vector<16x128xf32>
    %5 = vector.shape_cast %4 : vector<16x128xf32> to vector<2x8x128xf32>
    %cst_4 = arith.constant 0.000000e+00 : f32
    %6 = vector.broadcast %cst_4 : f32 to vector<8x16xf32>
    %7 = vector.extract_strided_slice %5 {offsets = [0, 0, 0], sizes = [1, 8, 64], strides = [1, 1, 1]} : vector<2x8x128xf32> to vector<1x8x64xf32>
    %8 = vector.shape_cast %7 : vector<1x8x64xf32> to vector<8x64xf32>
    %c0_5 = arith.constant 0 : index
    %c0_6 = arith.constant 0 : index
    %9 = vector.load %arg3[%c0_5, %c0_6] : memref<16x64xbf16, #tpu.memory_space<vmem>>, vector<16x64xbf16>
    %c0_7 = arith.constant 0 : index
    %c0_8 = arith.constant 0 : index
    %10 = vector.load %arg4[%c0_7, %c0_8] : memref<1x64xf32, #tpu.memory_space<vmem>>, vector<1x64xf32>
    %11 = arith.truncf %6 : vector<8x16xf32> to vector<8x16xbf16>
    %cst_9 = arith.constant dense<0.000000e+00> : vector<8x64xf32>
    %12 = tpu.matmul %11, %9, %cst_9 {dimension_numbers = #tpu.dot_dimension_numbers<[1], [0], [0], [1], [0, 0, 1, 1], [], []>} : vector<8x16xbf16>, vector<16x64xbf16>, vector<8x64xf32> -> vector<8x64xf32>
    %13 = arith.addf %8, %12 : vector<8x64xf32>
    %14 = vector.broadcast %10 : vector<1x64xf32> to vector<8x64xf32>
    %15 = arith.addf %13, %14 : vector<8x64xf32>
    %16 = vector.extract_strided_slice %15 {offsets = [0, 0], sizes = [8, 16], strides = [1, 1]} : vector<8x64xf32> to vector<8x16xf32>
    %cst_10 = arith.constant 0.000000e+00 : f32
    %17 = vector.broadcast %cst_10 : f32 to vector<8x16xf32>
    %18 = arith.subf %17, %16 : vector<8x16xf32>
    %19 = math.exp %18 : vector<8x16xf32>
    %cst_11 = arith.constant 1.000000e+00 : f32
    %20 = vector.broadcast %cst_11 : f32 to vector<8x16xf32>
    %21 = arith.addf %20, %19 : vector<8x16xf32>
    %cst_12 = arith.constant 1.000000e+00 : f32
    %22 = vector.broadcast %cst_12 : f32 to vector<8x16xf32>
    %23 = arith.divf %22, %21 : vector<8x16xf32>
    %24 = vector.extract_strided_slice %15 {offsets = [0, 16], sizes = [8, 16], strides = [1, 1]} : vector<8x64xf32> to vector<8x16xf32>
    %cst_13 = arith.constant 0.000000e+00 : f32
    %25 = vector.broadcast %cst_13 : f32 to vector<8x16xf32>
    %26 = arith.subf %25, %24 : vector<8x16xf32>
    %27 = math.exp %26 : vector<8x16xf32>
    %cst_14 = arith.constant 1.000000e+00 : f32
    %28 = vector.broadcast %cst_14 : f32 to vector<8x16xf32>
    %29 = arith.addf %28, %27 : vector<8x16xf32>
    %cst_15 = arith.constant 1.000000e+00 : f32
    %30 = vector.broadcast %cst_15 : f32 to vector<8x16xf32>
    %31 = arith.divf %30, %29 : vector<8x16xf32>
    %32 = vector.extract_strided_slice %15 {offsets = [0, 32], sizes = [8, 16], strides = [1, 1]} : vector<8x64xf32> to vector<8x16xf32>
    %33 = math.tanh %32 : vector<8x16xf32>
    %34 = vector.extract_strided_slice %15 {offsets = [0, 48], sizes = [8, 16], strides = [1, 1]} : vector<8x64xf32> to vector<8x16xf32>
    %cst_16 = arith.constant 0.000000e+00 : f32
    %35 = vector.broadcast %cst_16 : f32 to vector<8x16xf32>
    %36 = arith.subf %35, %34 : vector<8x16xf32>
    %37 = math.exp %36 : vector<8x16xf32>
    %cst_17 = arith.constant 1.000000e+00 : f32
    %38 = vector.broadcast %cst_17 : f32 to vector<8x16xf32>
    %39 = arith.addf %38, %37 : vector<8x16xf32>
    %cst_18 = arith.constant 1.000000e+00 : f32
    %40 = vector.broadcast %cst_18 : f32 to vector<8x16xf32>
    %41 = arith.divf %40, %39 : vector<8x16xf32>
    %42 = arith.mulf %31, %6 : vector<8x16xf32>
    %43 = arith.mulf %23, %33 : vector<8x16xf32>
    %44 = arith.addf %42, %43 : vector<8x16xf32>
    %45 = math.tanh %44 : vector<8x16xf32>
    %46 = arith.mulf %41, %45 : vector<8x16xf32>
    %c0_19 = arith.constant 0 : index
    %c0_20 = arith.constant 0 : index
    %c0_21 = arith.constant 0 : index
    %47 = vector.load %arg10[%c0_19, %c0_20, %c0_21] : memref<2x8x16xf32, #tpu.memory_space<vmem>>, vector<1x8x16xf32>
    %48 = vector.shape_cast %47 : vector<1x8x16xf32> to vector<8x16xf32>
    %49 = vector.shape_cast %46 : vector<8x16xf32> to vector<1x8x16xf32>
    tpu.vector_store %arg10[%c0_19, %c0_20, %c0_21], %49 {strides = array<i32>} : memref<2x8x16xf32, #tpu.memory_space<vmem>>, vector<1x8x16xf32>,
    %50 = vector.extract_strided_slice %5 {offsets = [1, 0, 0], sizes = [1, 8, 64], strides = [1, 1, 1]} : vector<2x8x128xf32> to vector<1x8x64xf32>
    %51 = vector.shape_cast %50 : vector<1x8x64xf32> to vector<8x64xf32>
    %c0_22 = arith.constant 0 : index
    %c0_23 = arith.constant 0 : index
    %52 = vector.load %arg3[%c0_22, %c0_23] : memref<16x64xbf16, #tpu.memory_space<vmem>>, vector<16x64xbf16>
    %c0_24 = arith.constant 0 : index
    %c0_25 = arith.constant 0 : index
    %53 = vector.load %arg4[%c0_24, %c0_25] : memref<1x64xf32, #tpu.memory_space<vmem>>, vector<1x64xf32>
    %54 = arith.truncf %46 : vector<8x16xf32> to vector<8x16xbf16>
    %cst_26 = arith.constant dense<0.000000e+00> : vector<8x64xf32>
    %55 = tpu.matmul %54, %52, %cst_26 {dimension_numbers = #tpu.dot_dimension_numbers<[1], [0], [0], [1], [0, 0, 1, 1], [], []>} : vector<8x16xbf16>, vector<16x64xbf16>, vector<8x64xf32> -> vector<8x64xf32>
    %56 = arith.addf %51, %55 : vector<8x64xf32>
    %57 = vector.broadcast %53 : vector<1x64xf32> to vector<8x64xf32>
    %58 = arith.addf %56, %57 : vector<8x64xf32>
    %59 = vector.extract_strided_slice %58 {offsets = [0, 0], sizes = [8, 16], strides = [1, 1]} : vector<8x64xf32> to vector<8x16xf32>
    %cst_27 = arith.constant 0.000000e+00 : f32
    %60 = vector.broadcast %cst_27 : f32 to vector<8x16xf32>
    %61 = arith.subf %60, %59 : vector<8x16xf32>
    %62 = math.exp %61 : vector<8x16xf32>
    %cst_28 = arith.constant 1.000000e+00 : f32
    %63 = vector.broadcast %cst_28 : f32 to vector<8x16xf32>
    %64 = arith.addf %63, %62 : vector<8x16xf32>
    %cst_29 = arith.constant 1.000000e+00 : f32
    %65 = vector.broadcast %cst_29 : f32 to vector<8x16xf32>
    %66 = arith.divf %65, %64 : vector<8x16xf32>
    %67 = vector.extract_strided_slice %58 {offsets = [0, 16], sizes = [8, 16], strides = [1, 1]} : vector<8x64xf32> to vector<8x16xf32>
    %cst_30 = arith.constant 0.000000e+00 : f32
    %68 = vector.broadcast %cst_30 : f32 to vector<8x16xf32>
    %69 = arith.subf %68, %67 : vector<8x16xf32>
    %70 = math.exp %69 : vector<8x16xf32>
    %cst_31 = arith.constant 1.000000e+00 : f32
    %71 = vector.broadcast %cst_31 : f32 to vector<8x16xf32>
    %72 = arith.addf %71, %70 : vector<8x16xf32>
    %cst_32 = arith.constant 1.000000e+00 : f32
    %73 = vector.broadcast %cst_32 : f32 to vector<8x16xf32>
    %74 = arith.divf %73, %72 : vector<8x16xf32>
    %75 = vector.extract_strided_slice %58 {offsets = [0, 32], sizes = [8, 16], strides = [1, 1]} : vector<8x64xf32> to vector<8x16xf32>
    %76 = math.tanh %75 : vector<8x16xf32>
    %77 = vector.extract_strided_slice %58 {offsets = [0, 48], sizes = [8, 16], strides = [1, 1]} : vector<8x64xf32> to vector<8x16xf32>
    %cst_33 = arith.constant 0.000000e+00 : f32
    %78 = vector.broadcast %cst_33 : f32 to vector<8x16xf32>
    %79 = arith.subf %78, %77 : vector<8x16xf32>
    %80 = math.exp %79 : vector<8x16xf32>
    %cst_34 = arith.constant 1.000000e+00 : f32
    %81 = vector.broadcast %cst_34 : f32 to vector<8x16xf32>
    %82 = arith.addf %81, %80 : vector<8x16xf32>
    %cst_35 = arith.constant 1.000000e+00 : f32
    %83 = vector.broadcast %cst_35 : f32 to vector<8x16xf32>
    %84 = arith.divf %83, %82 : vector<8x16xf32>
    %85 = arith.mulf %74, %44 : vector<8x16xf32>
    %86 = arith.mulf %66, %76 : vector<8x16xf32>
    %87 = arith.addf %85, %86 : vector<8x16xf32>
    %88 = math.tanh %87 : vector<8x16xf32>
    %89 = arith.mulf %84, %88 : vector<8x16xf32>
    %c1 = arith.constant 1 : index
    %c0_36 = arith.constant 0 : index
    %c0_37 = arith.constant 0 : index
    %90 = vector.load %arg10[%c1, %c0_36, %c0_37] : memref<2x8x16xf32, #tpu.memory_space<vmem>>, vector<1x8x16xf32>
    %91 = vector.shape_cast %90 : vector<1x8x16xf32> to vector<8x16xf32>
    %92 = vector.shape_cast %89 : vector<8x16xf32> to vector<1x8x16xf32>
    tpu.vector_store %arg10[%c1, %c0_36, %c0_37], %92 {strides = array<i32>} : memref<2x8x16xf32, #tpu.memory_space<vmem>>, vector<1x8x16xf32>,
    %93 = vector.extract_strided_slice %5 {offsets = [1, 0, 64], sizes = [1, 8, 64], strides = [1, 1, 1]} : vector<2x8x128xf32> to vector<1x8x64xf32>
    %94 = vector.shape_cast %93 : vector<1x8x64xf32> to vector<8x64xf32>
    %c0_38 = arith.constant 0 : index
    %c0_39 = arith.constant 0 : index
    %95 = vector.load %arg5[%c0_38, %c0_39] : memref<16x64xbf16, #tpu.memory_space<vmem>>, vector<16x64xbf16>
    %c0_40 = arith.constant 0 : index
    %c0_41 = arith.constant 0 : index
    %96 = vector.load %arg6[%c0_40, %c0_41] : memref<1x64xf32, #tpu.memory_space<vmem>>, vector<1x64xf32>
    %97 = arith.truncf %6 : vector<8x16xf32> to vector<8x16xbf16>
    %cst_42 = arith.constant dense<0.000000e+00> : vector<8x64xf32>
    %98 = tpu.matmul %97, %95, %cst_42 {dimension_numbers = #tpu.dot_dimension_numbers<[1], [0], [0], [1], [0, 0, 1, 1], [], []>} : vector<8x16xbf16>, vector<16x64xbf16>, vector<8x64xf32> -> vector<8x64xf32>
    %99 = arith.addf %94, %98 : vector<8x64xf32>
    %100 = vector.broadcast %96 : vector<1x64xf32> to vector<8x64xf32>
    %101 = arith.addf %99, %100 : vector<8x64xf32>
    %102 = vector.extract_strided_slice %101 {offsets = [0, 0], sizes = [8, 16], strides = [1, 1]} : vector<8x64xf32> to vector<8x16xf32>
    %cst_43 = arith.constant 0.000000e+00 : f32
    %103 = vector.broadcast %cst_43 : f32 to vector<8x16xf32>
    %104 = arith.subf %103, %102 : vector<8x16xf32>
    %105 = math.exp %104 : vector<8x16xf32>
    %cst_44 = arith.constant 1.000000e+00 : f32
    %106 = vector.broadcast %cst_44 : f32 to vector<8x16xf32>
    %107 = arith.addf %106, %105 : vector<8x16xf32>
    %cst_45 = arith.constant 1.000000e+00 : f32
    %108 = vector.broadcast %cst_45 : f32 to vector<8x16xf32>
    %109 = arith.divf %108, %107 : vector<8x16xf32>
    %110 = vector.extract_strided_slice %101 {offsets = [0, 16], sizes = [8, 16], strides = [1, 1]} : vector<8x64xf32> to vector<8x16xf32>
    %cst_46 = arith.constant 0.000000e+00 : f32
    %111 = vector.broadcast %cst_46 : f32 to vector<8x16xf32>
    %112 = arith.subf %111, %110 : vector<8x16xf32>
    %113 = math.exp %112 : vector<8x16xf32>
    %cst_47 = arith.constant 1.000000e+00 : f32
    %114 = vector.broadcast %cst_47 : f32 to vector<8x16xf32>
    %115 = arith.addf %114, %113 : vector<8x16xf32>
    %cst_48 = arith.constant 1.000000e+00 : f32
    %116 = vector.broadcast %cst_48 : f32 to vector<8x16xf32>
    %117 = arith.divf %116, %115 : vector<8x16xf32>
    %118 = vector.extract_strided_slice %101 {offsets = [0, 32], sizes = [8, 16], strides = [1, 1]} : vector<8x64xf32> to vector<8x16xf32>
    %119 = math.tanh %118 : vector<8x16xf32>
    %120 = vector.extract_strided_slice %101 {offsets = [0, 48], sizes = [8, 16], strides = [1, 1]} : vector<8x64xf32> to vector<8x16xf32>
    %cst_49 = arith.constant 0.000000e+00 : f32
    %121 = vector.broadcast %cst_49 : f32 to vector<8x16xf32>
    %122 = arith.subf %121, %120 : vector<8x16xf32>
    %123 = math.exp %122 : vector<8x16xf32>
    %cst_50 = arith.constant 1.000000e+00 : f32
    %124 = vector.broadcast %cst_50 : f32 to vector<8x16xf32>
    %125 = arith.addf %124, %123 : vector<8x16xf32>
    %cst_51 = arith.constant 1.000000e+00 : f32
    %126 = vector.broadcast %cst_51 : f32 to vector<8x16xf32>
    %127 = arith.divf %126, %125 : vector<8x16xf32>
    %128 = arith.mulf %117, %6 : vector<8x16xf32>
    %129 = arith.mulf %109, %119 : vector<8x16xf32>
    %130 = arith.addf %128, %129 : vector<8x16xf32>
    %131 = math.tanh %130 : vector<8x16xf32>
    %132 = arith.mulf %127, %131 : vector<8x16xf32>
    %c1_52 = arith.constant 1 : index
    %c0_53 = arith.constant 0 : index
    %c0_54 = arith.constant 0 : index
    %133 = vector.load %arg11[%c1_52, %c0_53, %c0_54] : memref<2x8x16xf32, #tpu.memory_space<vmem>>, vector<1x8x16xf32>
    %134 = vector.shape_cast %133 : vector<1x8x16xf32> to vector<8x16xf32>
    %135 = vector.shape_cast %132 : vector<8x16xf32> to vector<1x8x16xf32>
    tpu.vector_store %arg11[%c1_52, %c0_53, %c0_54], %135 {strides = array<i32>} : memref<2x8x16xf32, #tpu.memory_space<vmem>>, vector<1x8x16xf32>,
    %136 = vector.extract_strided_slice %5 {offsets = [0, 0, 64], sizes = [1, 8, 64], strides = [1, 1, 1]} : vector<2x8x128xf32> to vector<1x8x64xf32>
    %137 = vector.shape_cast %136 : vector<1x8x64xf32> to vector<8x64xf32>
    %c0_55 = arith.constant 0 : index
    %c0_56 = arith.constant 0 : index
    %138 = vector.load %arg5[%c0_55, %c0_56] : memref<16x64xbf16, #tpu.memory_space<vmem>>, vector<16x64xbf16>
    %c0_57 = arith.constant 0 : index
    %c0_58 = arith.constant 0 : index
    %139 = vector.load %arg6[%c0_57, %c0_58] : memref<1x64xf32, #tpu.memory_space<vmem>>, vector<1x64xf32>
    %140 = arith.truncf %132 : vector<8x16xf32> to vector<8x16xbf16>
    %cst_59 = arith.constant dense<0.000000e+00> : vector<8x64xf32>
    %141 = tpu.matmul %140, %138, %cst_59 {dimension_numbers = #tpu.dot_dimension_numbers<[1], [0], [0], [1], [0, 0, 1, 1], [], []>} : vector<8x16xbf16>, vector<16x64xbf16>, vector<8x64xf32> -> vector<8x64xf32>
    %142 = arith.addf %137, %141 : vector<8x64xf32>
    %143 = vector.broadcast %139 : vector<1x64xf32> to vector<8x64xf32>
    %144 = arith.addf %142, %143 : vector<8x64xf32>
    %145 = vector.extract_strided_slice %144 {offsets = [0, 0], sizes = [8, 16], strides = [1, 1]} : vector<8x64xf32> to vector<8x16xf32>
    %cst_60 = arith.constant 0.000000e+00 : f32
    %146 = vector.broadcast %cst_60 : f32 to vector<8x16xf32>
    %147 = arith.subf %146, %145 : vector<8x16xf32>
    %148 = math.exp %147 : vector<8x16xf32>
    %cst_61 = arith.constant 1.000000e+00 : f32
    %149 = vector.broadcast %cst_61 : f32 to vector<8x16xf32>
    %150 = arith.addf %149, %148 : vector<8x16xf32>
    %cst_62 = arith.constant 1.000000e+00 : f32
    %151 = vector.broadcast %cst_62 : f32 to vector<8x16xf32>
    %152 = arith.divf %151, %150 : vector<8x16xf32>
    %153 = vector.extract_strided_slice %144 {offsets = [0, 16], sizes = [8, 16], strides = [1, 1]} : vector<8x64xf32> to vector<8x16xf32>
    %cst_63 = arith.constant 0.000000e+00 : f32
    %154 = vector.broadcast %cst_63 : f32 to vector<8x16xf32>
    %155 = arith.subf %154, %153 : vector<8x16xf32>
    %156 = math.exp %155 : vector<8x16xf32>
    %cst_64 = arith.constant 1.000000e+00 : f32
    %157 = vector.broadcast %cst_64 : f32 to vector<8x16xf32>
    %158 = arith.addf %157, %156 : vector<8x16xf32>
    %cst_65 = arith.constant 1.000000e+00 : f32
    %159 = vector.broadcast %cst_65 : f32 to vector<8x16xf32>
    %160 = arith.divf %159, %158 : vector<8x16xf32>
    %161 = vector.extract_strided_slice %144 {offsets = [0, 32], sizes = [8, 16], strides = [1, 1]} : vector<8x64xf32> to vector<8x16xf32>
    %162 = math.tanh %161 : vector<8x16xf32>
    %163 = vector.extract_strided_slice %144 {offsets = [0, 48], sizes = [8, 16], strides = [1, 1]} : vector<8x64xf32> to vector<8x16xf32>
    %cst_66 = arith.constant 0.000000e+00 : f32
    %164 = vector.broadcast %cst_66 : f32 to vector<8x16xf32>
    %165 = arith.subf %164, %163 : vector<8x16xf32>
    %166 = math.exp %165 : vector<8x16xf32>
    %cst_67 = arith.constant 1.000000e+00 : f32
    %167 = vector.broadcast %cst_67 : f32 to vector<8x16xf32>
    %168 = arith.addf %167, %166 : vector<8x16xf32>
    %cst_68 = arith.constant 1.000000e+00 : f32
    %169 = vector.broadcast %cst_68 : f32 to vector<8x16xf32>
    %170 = arith.divf %169, %168 : vector<8x16xf32>
    %171 = arith.mulf %160, %130 : vector<8x16xf32>
    %172 = arith.mulf %152, %162 : vector<8x16xf32>
    %173 = arith.addf %171, %172 : vector<8x16xf32>
    %174 = math.tanh %173 : vector<8x16xf32>
    %175 = arith.mulf %170, %174 : vector<8x16xf32>
    %c0_69 = arith.constant 0 : index
    %c0_70 = arith.constant 0 : index
    %c0_71 = arith.constant 0 : index
    %176 = vector.load %arg11[%c0_69, %c0_70, %c0_71] : memref<2x8x16xf32, #tpu.memory_space<vmem>>, vector<1x8x16xf32>
    %177 = vector.shape_cast %176 : vector<1x8x16xf32> to vector<8x16xf32>
    %178 = vector.shape_cast %175 : vector<8x16xf32> to vector<1x8x16xf32>
    tpu.vector_store %arg11[%c0_69, %c0_70, %c0_71], %178 {strides = array<i32>} : memref<2x8x16xf32, #tpu.memory_space<vmem>>, vector<1x8x16xf32>,
    %c0_72 = arith.constant 0 : index
    %c0_73 = arith.constant 0 : index
    %c0_74 = arith.constant 0 : index
    %179 = vector.load %arg10[%c0_72, %c0_73, %c0_74] : memref<2x8x16xf32, #tpu.memory_space<vmem>>, vector<2x8x16xf32>
    %c0_75 = arith.constant 0 : index
    %c0_76 = arith.constant 0 : index
    %c0_77 = arith.constant 0 : index
    %180 = vector.load %arg11[%c0_75, %c0_76, %c0_77] : memref<2x8x16xf32, #tpu.memory_space<vmem>>, vector<2x8x16xf32>
    %181 = tpu.concatenate %179, %180 in 2 : vector<2x8x16xf32>, vector<2x8x16xf32> -> vector<2x8x32xf32>
    %cst_78 = arith.constant dense<0.000000e+00> : vector<2x32xf32>
    %182 = vector.multi_reduction <add>, %181, %cst_78 [1] : vector<2x8x32xf32> to vector<2x32xf32>
    %cst_79 = arith.constant 8.000000e+00 : f32
    %183 = vector.broadcast %cst_79 : f32 to vector<2x32xf32>
    %184 = arith.divf %182, %183 : vector<2x32xf32>
    %cst_80 = arith.constant dense<0xFF800000> : vector<2x32xf32>
    %185 = vector.multi_reduction <maximumf>, %181, %cst_80 [1] : vector<2x8x32xf32> to vector<2x32xf32>
    %186 = tpu.concatenate %184, %185 in 1 : vector<2x32xf32>, vector<2x32xf32> -> vector<2x64xf32>
    %187 = arith.truncf %186 : vector<2x64xf32> to vector<2x64xbf16>
    %c0_81 = arith.constant 0 : index
    %c0_82 = arith.constant 0 : index
    %188 = vector.load %arg7[%c0_81, %c0_82] : memref<64x3xbf16, #tpu.memory_space<vmem>>, vector<64x3xbf16>
    %cst_83 = arith.constant dense<0.000000e+00> : vector<2x3xf32>
    %189 = tpu.matmul %187, %188, %cst_83 {dimension_numbers = #tpu.dot_dimension_numbers<[1], [0], [0], [1], [0, 0, 1, 1], [], []>} : vector<2x64xbf16>, vector<64x3xbf16>, vector<2x3xf32> -> vector<2x3xf32>
    %c0_84 = arith.constant 0 : index
    %c0_85 = arith.constant 0 : index
    %190 = vector.load %arg8[%c0_84, %c0_85] : memref<1x3xf32, #tpu.memory_space<vmem>>, vector<1x3xf32>
    %191 = vector.broadcast %190 : vector<1x3xf32> to vector<2x3xf32>
    %192 = arith.addf %189, %191 : vector<2x3xf32>
    %c0_86 = arith.constant 0 : index
    %c0_87 = arith.constant 0 : index
    %193 = vector.load %arg9[%c0_86, %c0_87] : memref<2x3xf32, #tpu.memory_space<vmem>>, vector<2x3xf32>
    tpu.vector_store %arg9[%c0_86, %c0_87], %192 {strides = array<i32>} : memref<2x3xf32, #tpu.memory_space<vmem>>, vector<2x3xf32>,
    return
  }
  func.func @transform_0(%arg0: i32) -> (i32, i32, i32) {
    %c0_i32 = arith.constant 0 : i32
    %c0_i32_0 = arith.constant 0 : i32
    %c0_i32_1 = arith.constant 0 : i32
    %c0_i32_2 = arith.constant 0 : i32
    return %c0_i32, %c0_i32_0, %c0_i32_1 : i32, i32, i32
  }
  func.func @transform_1(%arg0: i32) -> (i32, i32) {
    %c0_i32 = arith.constant 0 : i32
    %c0_i32_0 = arith.constant 0 : i32
    %c0_i32_1 = arith.constant 0 : i32
    return %c0_i32, %c0_i32_0 : i32, i32
  }
  func.func @transform_2(%arg0: i32) -> (i32, i32) {
    %c0_i32 = arith.constant 0 : i32
    %c0_i32_0 = arith.constant 0 : i32
    %c0_i32_1 = arith.constant 0 : i32
    return %c0_i32, %c0_i32_0 : i32, i32
  }
  func.func @transform_3(%arg0: i32) -> (i32, i32) {
    %c0_i32 = arith.constant 0 : i32
    %c0_i32_0 = arith.constant 0 : i32
    %c0_i32_1 = arith.constant 0 : i32
    return %c0_i32, %c0_i32_0 : i32, i32
  }
  func.func @transform_4(%arg0: i32) -> (i32, i32) {
    %c0_i32 = arith.constant 0 : i32
    %c0_i32_0 = arith.constant 0 : i32
    %c0_i32_1 = arith.constant 0 : i32
    return %c0_i32, %c0_i32_0 : i32, i32
  }
  func.func @transform_5(%arg0: i32) -> (i32, i32) {
    %c0_i32 = arith.constant 0 : i32
    %c0_i32_0 = arith.constant 0 : i32
    %c0_i32_1 = arith.constant 0 : i32
    return %c0_i32, %c0_i32_0 : i32, i32
  }
  func.func @transform_6(%arg0: i32) -> (i32, i32) {
    %c0_i32 = arith.constant 0 : i32
    %c0_i32_0 = arith.constant 0 : i32
    %c0_i32_1 = arith.constant 0 : i32
    return %c0_i32, %c0_i32_0 : i32, i32
  }
  func.func @transform_7(%arg0: i32) -> (i32, i32) {
    %c0_i32 = arith.constant 0 : i32
    %c0_i32_0 = arith.constant 0 : i32
    %c0_i32_1 = arith.constant 0 : i32
    return %c0_i32, %c0_i32_0 : i32, i32
  }
  func.func @transform_8(%arg0: i32) -> (i32, i32) {
    %c0_i32 = arith.constant 0 : i32
    %c0_i32_0 = arith.constant 0 : i32
    %c0_i32_1 = arith.constant 0 : i32
    return %c0_i32, %c0_i32_0 : i32, i32
  }
}

</mosaic_0001>

<bundles_post_ra>
// kernel: forward.4
= control target key start
LH: loop header
LB: loop body
LE: loop exit
PB: predicated region body
PF: predicated region fallthrough
CT: control target
= control target key end

     0   :  { %vm18_vm0 = vcmask 261120   ;;  %s118_s0 = inlined_call_operand.vmem [shape: f32[16,32], index: 0, kind: input, shape index: {}]   ;;  %s119_s1 = inlined_call_operand.vmem [shape: f32[1,32], index: 1, kind: input, shape index: {}]   ;;  %s120_s2 = inlined_call_operand.vmem [shape: f32[1,32], index: 2, kind: input, shape index: {}]   ;;  %s121_s3 = inlined_call_operand.vmem [shape: f32[16,32], index: 3, kind: output, shape index: {}]  }
   0x1   :  { %v14_v0 = vld [vmem:[%s118_s0] sm:$0xff]  ;;  %v15_v1 = vld [vmem:[%s118_s0 + $0x8] sm:$0xff] }
   0x2   :  { %v19_v2 = vsel %vm18_vm0, %v14_v0, 0.0  ;;  %v22_v3 = vsel %vm18_vm0, %v15_v1, 0.0  ;;  %v68_v21 = vld [vmem:[%s119_s1] ss:$0 sm:$0xff] }
   0x3   :  { %20 = vadd.xlane.f32.xlu0 %v19_v2  ;;  %v69_v23 = vld [vmem:[%s120_s2] ss:$0 sm:$0xff] }
   0x7   :  { %23 = vadd.xlane.f32.xlu0 %v22_v3 }
  0x90   :  { %v21_v4 = vpop.xlane.xlu0 %20 }
  0x91   :  { %v26_v5 = vmul.f32 0.03125, %v21_v4 }
  0x93   :  { %v28_v6 = vsub.f32 %v14_v0, %v26_v5 }
  0x94   :  { %v24_v7 = vpop.xlane.xlu0 %23 }
  0x95   :  { %v27_v8 = vmul.f32 0.03125, %v24_v7  ;;  %v30_v9 = vmul.f32 %v28_v6, %v28_v6 }
  0x97   :  { %v29_v10 = vsub.f32 %v15_v1, %v27_v8  ;;  %v32_v11 = vsel %vm18_vm0, %v30_v9, 0.0 }
  0x98   :  { %33 = vadd.xlane.f32.xlu1 %v32_v11 }
  0x99   :  { %v31_v12 = vmul.f32 %v29_v10, %v29_v10 }
  0x9b   :  { %v35_v13 = vsel %vm18_vm0, %v31_v12, 0.0 }
  0x9c   :  { %36 = vadd.xlane.f32.xlu1 %v35_v13 }
 0x125   :  { %v34_v14 = vpop.xlane.xlu1 %33 }
 0x126   :  { %v38_v15 = vmul.f32 0.03125, %v34_v14 }
 0x128   :  { %v40_v16 = vadd.f32 1e-12, %v38_v15 }
 0x129   :  { %v37_v17 = vpop.xlane.xlu1 %36 }
 0x12a   :  { %70 = vrsqrt.f32 %v40_v16  ;;  %v39_v18 = vmul.f32 0.03125, %v37_v17 }
 0x12c   :  { %v41_v19 = vadd.f32 1e-12, %v39_v18 }
 0x12e   :  { %72 = vrsqrt.f32 %v41_v19 }
 0x134   :  { %v71_v20 = vpop.eup %70 }
 0x135   :  { %v44_v22 = vmul.f32 %v71_v20, %v28_v6 }
 0x137   :  { %v52_v24 = vmul.f32 %v68_v21, %v44_v22 }
 0x138   :  { %v73_v25 = vpop.eup %72 }
 0x139   :  { %v60_v26 = vadd.f32 %v69_v23, %v52_v24  ;;  %v45_v27 = vmul.f32 %v73_v25, %v29_v10 }
 0x13b   :  { %62 = vst.msk [vmem:[%s121_s3] sm:$0xff] %vm18_vm0, %v60_v26  ;;  %v53_v28 = vmul.f32 %v68_v21, %v45_v27 }
 0x13d   :  { %v61_v29 = vadd.f32 %v69_v23, %v53_v28 }
 0x13f   :  { %63 = vst.msk [vmem:[%s121_s3 + $0x8] sm:$0xff] %vm18_vm0, %v61_v29 }

// kernel: forward.7
= control target key start
LH: loop header
LB: loop body
LE: loop exit
PB: predicated region body
PF: predicated region fallthrough
CT: control target
= control target key end

     0   :  { %v782_v1 = vmov 0.0   ;;  %vm783_vm0 = vmmov 0   ;;  %vm50_vm1 = vcmask 261120   ;;  %v784_v7 = vmov 0   ;;  %s971_s0 = inlined_call_operand.vmem [shape: f32[2,8,32], index: 0, kind: input, shape index: {}]   ;;  %s972_s1 = inlined_call_operand.vmem [shape: bf16[32,128], index: 1, kind: input, shape index: {}]   ;;  %s973_s2 = inlined_call_operand.vmem [shape: bf16[16,64], index: 2, kind: input, shape index: {}]   ;;  %s974_s3 = inlined_call_operand.vmem [shape: f32[1,64], index: 3, kind: input, shape index: {}]   ;;  %s975_s4 = inlined_call_operand.vmem [shape: bf16[16,64], index: 4, kind: input, shape index: {}]   ;;  %s976_s5 = inlined_call_operand.vmem [shape: f32[1,64], index: 5, kind: input, shape index: {}]   ;;  %s977_s6 = inlined_call_operand.vmem [shape: bf16[64,3], index: 6, kind: input, shape index: {}]   ;;  %s978_s7 = inlined_call_operand.vmem [shape: f32[1,3], index: 7, kind: input, shape index: {}]   ;;  %s979_s8 = inlined_call_operand.hbm [shape: f32[2,3], index: 8, kind: output, shape index: {}]  }
   0x1   :  { %v716_v0 = vld [vmem:[%s972_s1] sm:$0xff]   ;;  %663 = vmatprep.subr.bf16.mxu0 %v782_v1  ;;  %671 = vmatprep.subr.bf16.mxu1 %v782_v1  ;;  %v718_v3 = vld [vmem:[%s972_s1 + $0x8] sm:$0xff]  }
   0x2   :  { %v717_v2 = vld [vmem:[%s973_s2] sm:$0xff]   ;;  %664 = vmatpush3.bf16.msra.mxu0 %v716_v0  ;;  %673 = vmatprep.mubr.msk.bf16.mxu1 %vm783_vm0, %v782_v1  ;;  %v32_v5 = vld [vmem:[%s971_s0 + $0x8] sm:$0xff] }
   0x3   :  { %672 = vmatpush3.bf16.msra.mxu1 %v717_v2  ;;  %665 = vmatprep.subr.bf16.mxu0 %v782_v1  ;;  %v31_v4 = vld [vmem:[%s971_s0] sm:$0xff] }
   0x4   :  { %667 = vmatprep.mubr.msk.bf16.mxu0 %vm783_vm0, %v782_v1  ;;  %677 = vmatprep.subr.bf16.mxu1 %v782_v1  ;;  %v33_v6 = vpack.c.bf16 %v32_v5, %v31_v4 }
   0x6   :  { %666 = vmatpush3.bf16.msra.mxu0 %v718_v3  ;;  %674 = vmatmul.mubr.bf16.vlgmr.msra.gmra.mrb[0].mxu1 %v784_v7 }
   0x7   :  { %679 = vmatprep.mubr.msk.bf16.mxu1 %vm783_vm0, %v782_v1  ;;  %695 = vmatprep.subr.bf16.mxu0 %v782_v1 }
   0x8   :  { %13 = vsyncpa [#allocation5], 0  ;;  %v870_v12 = vld [vmem:[%s974_s3] ss:$0 sm:$0xff]  ;;  %s785_s15 = smov 96   ;;  %s786_s3 = smov 16  }
   0x9   :  { %668 = vmatmul.mubr.msk.bf16.vlgmr.msra.gmra.mrb[0].mxu0 %vm50_vm1, %v33_v6  ;;  %v719_v30 = vld [vmem:[%s973_s2] sm:$0xff]   ;;  %s787_s18 = smov 32   ;;  %s788_s19 = smov 80   ;;  %vm104_vm2 = vcmask 130048   ;;  %vm518_vm3 = vcmask 1041409   ;;  %vm568_vm4 = vcmask 523264  }
   0xa   :  { %703 = vmatprep.mubr.msk.bf16.mxu0 %vm783_vm0, %v782_v1  ;;  %678 = vmatpush3.bf16.msra.mxu1 %v719_v30  ;;  %v720_v35 = vld [vmem:[%s975_s4] sm:$0xff]   ;;  %s789_s23 = smov 64   ;;  %s790_s11 = smov [#allocation4]   ;;  %vm612_vm5 = vcmask 17408  }
   0xb   :  { %683 = vmatprep.subr.bf16.mxu1 %v782_v1  ;;  %v637_v37 = vld [vmem:[%s976_s5] ss:$0 sm:$0xff]  ;;  %s620_s12 = sshll.u32 %s790_s11, 4  ;;  %s621_s12 = int_to_ptr.vmem [resolvable:$true] %s620_s12 }
   0xc   :  { %v721_v63 = vld [vmem:[%s975_s4] sm:$0xff]   ;;  %s758_s13 = scalar_lea.vmem %s621_s12, 32  ;;  %p763_p1 = scmp.lt.s32.totalorder %s621_s12, %s621_s12 }
   0xd   :  { %p759_p0 = scmp.ne.s32.totalorder %s621_s12, %s758_s13  ;;  %p764_p2 = scmp.lt.s32.totalorder %s758_s13, %s758_s13 }
   0xf   :  { %p765_p3 = por %p764_p2, %p763_p1 }
  0x11   :  { %p766_p4 = pnand %p765_p3, %p759_p0 }
  0xd9   :  { %v142_v8 = vpop.f32.mrb[0].mxu1 }
  0xda   :  { %v675_v9 = vpop.f32.mrb[1].mxu1 }
  0xdb   :  { %v145_v10 = vpop.f32.mrb[2].mxu1 }
  0xdc   :  { %v865_v11 = vpop.f32.mrb[0].mxu0  ;;  %v676_v13 = vpop.f32.mrb[3].mxu1 }
  0xdd   :  { %v148_v14 = vadd.f32 %v142_v8, %v865_v11  ;;  %v669_v15 = vpop.f32.mrb[1].mxu0 }
  0xde   :  { %v91_v16 = vpop.f32.mrb[2].mxu0 }
  0xdf   :  { %v155_v17 = vadd.f32 %v870_v12, %v148_v14  ;;  %v670_v18 = vpop.f32.mrb[3].mxu0 }
  0xe1   :  { %726 = vtanh.f32 %v155_v17  ;;  %v156_v20 = vsub.f32 0.0, %v155_v17 }
  0xe3   :  { %v157_v21 = vmul.f32 1.442695, %v156_v20 }
  0xe5   :  { %728 = vpow2.f32 %v157_v21 }
  0xeb   :  { %v727_v19 = vpop.eup %726 }
  0xec   :  { %165 = vrot.lane.b32.xlu0 %v727_v19, %s785_s15 }
  0xef   :  { %v729_v22 = vpop.eup %728 }
  0xf0   :  { %v159_v23 = vadd.f32 1.0, %v729_v22 }
  0xf2   :  { %730 = vrcp.f32 %v159_v23 }
  0xfc   :  { %v731_v24 = vpop.eup %730 }
  0xfd   :  { %v163_v27 = vmul.f32 0.0, %v731_v24 }
 0x15e   :  { %v166_v25 = vpop.permute.xlu0 %165 }
 0x15f   :  { %v168_v26 = vmul.f32 %v731_v24, %v166_v25 }
 0x161   :  { %170 = vrot.lane.b32.xlu0 %v168_v26, %s786_s3 }
 0x1d3   :  { %v171_v28 = vpop.permute.xlu0 %170 }
 0x1d4   :  { %v876_v29 = vadd.f32 %v171_v28, %v163_v27 }
 0x1d6   :  { %732 = vtanh.f32 %v876_v29 }
 0x1e0   :  { %v733_v31 = vpop.eup %732 }
 0x1e1   :  { %176 = vrot.lane.b32.xlu1 %v733_v31, %s787_s18 }
 0x253   :  { %v177_v32 = vpop.permute.xlu1 %176 }
 0x254   :  { %v884_v33 = vmul.f32 %v731_v24, %v177_v32 }
 0x256   :  { %v188_v34 = vpack.c.bf16 %v884_v33, %v884_v33 }
 0x258   :  { %190 = vrot.lane.b32.xlu1 %v188_v34, %s788_s19 }
 0x25c   :  { %338 = vrot.lane.b32.xlu1 %v637_v37, %s789_s23 }
 0x2ca   :  { %v191_v36 = vpop.permute.xlu1 %190 }
 0x2cb   :  { %680 = vmatmul.mubr.msk.bf16.vlgmr.msra.gmra.mrb[4].mxu1 %vm104_vm2, %v191_v36 }
 0x2cc   :  { %684 = vmatpush3.bf16.msra.mxu1 %v720_v35  ;;  %685 = vmatprep.mubr.msk.bf16.mxu1 %vm783_vm0, %v782_v1 }
 0x2cd   :  { %689 = vmatprep.subr.bf16.mxu1 %v782_v1 }
 0x2ce   :  { %v339_v48 = vpop.permute.xlu1 %338 }
 0x2d3   :  { %686 = vmatmul.mubr.bf16.vlgmr.msra.gmra.mrb[8].mxu1 %v784_v7 }
 0x2d4   :  { %691 = vmatprep.mubr.msk.bf16.mxu1 %vm783_vm0, %v782_v1  ;;  %690 = vmatpush3.bf16.msra.mxu1 %v721_v63 }
 0x39e   :  { %v235_v38 = vpop.f32.mrb[4].mxu1 }
 0x39f   :  { %v241_v39 = vadd.f32 %v235_v38, %v91_v16  ;;  %v681_v40 = vpop.f32.mrb[5].mxu1 }
 0x3a0   :  { %v238_v41 = vpop.f32.mrb[6].mxu1 }
 0x3a1   :  { %v682_v42 = vpop.f32.mrb[7].mxu1  ;;  %v248_v0 = vadd.f32 %v870_v12, %v241_v39 }
 0x3a3   :  { %v249_v6 = vsub.f32 0.0, %v248_v0 }
 0x3a5   :  { %v250_v7 = vmul.f32 1.442695, %v249_v6 }
 0x3a6   :  { %v322_v43 = vpop.f32.mrb[8].mxu1 }
 0x3a7   :  { %329 = vrot.lane.b32.xlu0 %v322_v43, %s789_s23  ;;  %v687_v44 = vpop.f32.mrb[9].mxu1 }
 0x3a8   :  { %v325_v45 = vpop.f32.mrb[10].mxu1 }
 0x3a9   :  { %v688_v46 = vpop.f32.mrb[11].mxu1 }
 0x419   :  { %v330_v47 = vpop.permute.xlu0 %329 }
 0x41a   :  { %v332_v49 = vadd.f32 %v330_v47, %v91_v16 }
 0x41c   :  { %v341_v50 = vadd.f32 %v339_v48, %v332_v49  ;;  %v722_v48 = vld [vmem:[%s977_s6] sm:$0xff]   ;;  %v723_v49 = vld [vmem:[%s977_s6 + $0x8] sm:$0xff]  }
 0x41d   :  { %696 = vmatpush3.bf16.msra.mxu0 %v722_v48 }
 0x41e   :  { %734 = vtanh.f32 %v341_v50  ;;  %v342_v52 = vsub.f32 0.0, %v341_v50  ;;  %697 = vmatprep.subr.bf16.mxu0 %v782_v1  ;;  %v724_v50 = vld [vmem:[%s977_s6 + $0x10] sm:$0xff]  }
 0x420   :  { %v343_v53 = vmul.f32 1.442695, %v342_v52 }
 0x421   :  { %698 = vmatpush3.bf16.msra.mxu0 %v723_v49 }
 0x422   :  { %736 = vpow2.f32 %v343_v53  ;;  %699 = vmatprep.subr.bf16.mxu0 %v782_v1 }
 0x425   :  { %700 = vmatpush3.bf16.msra.mxu0 %v724_v50 }
 0x426   :  { %701 = vmatprep.subr.bf16.mxu0 %v782_v1  ;;  %v725_v1 = vld [vmem:[%s977_s6 + $0x18] sm:$0xff]  }
 0x428   :  { %v735_v51 = vpop.eup %734 }
 0x429   :  { %351 = vrot.lane.b32.xlu0 %v735_v51, %s785_s15  ;;  %702 = vmatpush3.bf16.msra.mxu0 %v725_v1 }
 0x42c   :  { %v737_v54 = vpop.eup %736 }
 0x42d   :  { %v345_v55 = vadd.f32 1.0, %v737_v54 }
 0x42f   :  { %738 = vrcp.f32 %v345_v55 }
 0x439   :  { %v739_v56 = vpop.eup %738 }
 0x43a   :  { %v349_v59 = vmul.f32 0.0, %v739_v56 }
 0x49b   :  { %v352_v57 = vpop.permute.xlu0 %351 }
 0x49c   :  { %v354_v58 = vmul.f32 %v739_v56, %v352_v57 }
 0x49e   :  { %356 = vrot.lane.b32.xlu1 %v354_v58, %s786_s3 }
 0x510   :  { %v357_v60 = vpop.permute.xlu1 %356 }
 0x511   :  { %v359_v61 = vadd.f32 %v357_v60, %v349_v59 }
 0x513   :  { %740 = vtanh.f32 %v359_v61 }
 0x514   :  { %742 = vtanh.f32 %v248_v0 }
 0x515   :  { %744 = vpow2.f32 %v250_v7 }
 0x51d   :  { %v741_v62 = vpop.eup %740 }
 0x51e   :  { %362 = vrot.lane.b32.xlu0 %v741_v62, %s787_s18  ;;  %v743_v5 = vpop.eup %742 }
 0x51f   :  { %v745_v8 = vpop.eup %744 }
 0x520   :  { %v252_v9 = vadd.f32 1.0, %v745_v8 }
 0x522   :  { %746 = vrcp.f32 %v252_v9 }
 0x52c   :  { %v747_v13 = vpop.eup %746 }
 0x52d   :  { %v256_v16 = vmul.f32 %v747_v13, %v876_v29 }
 0x590   :  { %v363_v2 = vpop.permute.xlu0 %362 }
 0x591   :  { %v365_v3 = vmul.f32 %v739_v56, %v363_v2 }
 0x593   :  { %v375_v4 = vpack.c.bf16 %v365_v3, %v365_v3 }
 0x595   :  { %377 = vrot.lane.b32.xlu1 %v375_v4, %s786_s3 }
 0x599   :  { %438 = vrot.lane.b32.xlu1 %v637_v37, %s789_s23 }
 0x59d   :  { %258 = vrot.lane.b32.xlu1 %v743_v5, %s785_s15 }
 0x607   :  { %v378_v10 = vpop.permute.xlu1 %377 }
 0x608   :  { %692 = vmatmul.mubr.msk.bf16.vlgmr.msra.gmra.mrb[12].mxu1 %vm104_vm2, %v378_v10 }
 0x60b   :  { %v439_v12 = vpop.permute.xlu1 %438 }
 0x60f   :  { %v259_v14 = vpop.permute.xlu1 %258 }
 0x610   :  { %v261_v15 = vmul.f32 %v747_v13, %v259_v14 }
 0x612   :  { %263 = vrot.lane.b32.xlu1 %v261_v15, %s786_s3 }
 0x684   :  { %v264_v17 = vpop.permute.xlu1 %263 }
 0x685   :  { %v266_v18 = vadd.f32 %v264_v17, %v256_v16 }
 0x687   :  { %748 = vtanh.f32 %v266_v18 }
 0x691   :  { %v749_v19 = vpop.eup %748 }
 0x692   :  { %269 = vrot.lane.b32.xlu1 %v749_v19, %s787_s18 }
 0x6db   :  { %v422_v20 = vpop.f32.mrb[12].mxu1 }
 0x6dc   :  { %429 = vrot.lane.b32.xlu0 %v422_v20, %s789_s23  ;;  %v693_v21 = vpop.f32.mrb[13].mxu1 }
 0x6dd   :  { %v425_v22 = vpop.f32.mrb[14].mxu1 }
 0x6de   :  { %v694_v23 = vpop.f32.mrb[15].mxu1 }
 0x704   :  { %v270_v41 = vpop.permute.xlu1 %269 }
 0x705   :  { %v272_v43 = vmul.f32 %v747_v13, %v270_v41 }
 0x74e   :  { %v430_v24 = vpop.permute.xlu0 %429 }
 0x74f   :  { %v432_v25 = vadd.f32 %v430_v24, %v865_v11 }
 0x751   :  { %v441_v26 = vadd.f32 %v439_v12, %v432_v25 }
 0x753   :  { %750 = vtanh.f32 %v441_v26  ;;  %v442_v28 = vsub.f32 0.0, %v441_v26 }
 0x755   :  { %v443_v29 = vmul.f32 1.442695, %v442_v28 }
 0x757   :  { %752 = vpow2.f32 %v443_v29 }
 0x75d   :  { %v751_v27 = vpop.eup %750 }
 0x75e   :  { %451 = vrot.lane.b32.xlu0 %v751_v27, %s785_s15 }
 0x761   :  { %v753_v30 = vpop.eup %752 }
 0x762   :  { %v445_v31 = vadd.f32 1.0, %v753_v30  ;;  %v641_v30 = vld [vmem:[%s978_s7] ss:$0 sm:$0xff] }
 0x764   :  { %754 = vrcp.f32 %v445_v31 }
 0x76e   :  { %v755_v32 = vpop.eup %754 }
 0x76f   :  { %v449_v36 = vmul.f32 %v755_v32, %v359_v61 }
 0x7d0   :  { %v452_v34 = vpop.permute.xlu0 %451 }
 0x7d1   :  { %v454_v35 = vmul.f32 %v755_v32, %v452_v34 }
 0x7d3   :  { %456 = vrot.lane.b32.xlu0 %v454_v35, %s786_s3 }
 0x845   :  { %v457_v37 = vpop.permute.xlu0 %456 }
 0x846   :  { %v459_v38 = vadd.f32 %v457_v37, %v449_v36 }
 0x848   :  { %756 = vtanh.f32 %v459_v38 }
 0x852   :  { %v757_v11 = vpop.eup %756 }
 0x853   :  { %462 = vrot.lane.b32.xlu0 %v757_v11, %s787_s18 }
 0x857   :  { %367 = vrot.lane.b32.xlu0 %v365_v3, %s786_s3 }
 0x85b   :  { %181 = vrot.lane.b32.xlu0 %v884_v33, %s788_s19 }
 0x8c5   :  { %v463_v39 = vpop.permute.xlu0 %462 }
 0x8c6   :  { %v465_v40 = vmul.f32 %v755_v32, %v463_v39 }
 0x8c8   :  { %467 = vrot.lane.b32.xlu1 %v465_v40, %s786_s3 }
 0x8c9   :  { %v368_v42 = vpop.permute.xlu0 %367 }
 0x8ca   :  { %371 = vst.msk [vmem:[#allocation3 + $0x8] sm:$0xff] %vm104_vm2, %v368_v42 }
 0x8cc   :  { %274 = vrot.lane.b32.xlu1 %v272_v43, %s788_s19 }
 0x8cd   :  { %v182_v44 = vpop.permute.xlu0 %181 }
 0x8ce   :  { %184 = vst.msk [vmem:[#allocation2] sm:$0xff] %vm104_vm2, %v182_v44 }
 0x8d1   :  { %v474_v45 = vld [vmem:[#allocation3 + $0x8] sm:$0xff] }
 0x8d2   :  { %479 = vrot.lane.b32.xlu1 %v474_v45, %s786_s3 }
 0x8d5   :  { %v471_v61 = vld [vmem:[#allocation2] sm:$0xff] }
 0x93a   :  { %v468_v46 = vpop.permute.xlu1 %467 }
 0x93b   :  { %470 = vst.msk [vmem:[#allocation3] sm:$0xff] %vm104_vm2, %v468_v46 }
 0x93e   :  { %v275_v33 = vpop.permute.xlu1 %274 }
 0x93f   :  { %278 = vst.msk [vmem:[#allocation2 + $0x8] sm:$0xff] %vm104_vm2, %v275_v33 }
 0x942   :  { %v473_v47 = vld [vmem:[#allocation3] sm:$0xff] }
 0x943   :  { %477 = vrot.lane.b32.xlu0 %v473_v47, %s786_s3 }
 0x944   :  { %v480_v52 = vpop.permute.xlu1 %479 }
 0x946   :  { %v472_v51 = vld [vmem:[#allocation2 + $0x8] sm:$0xff] }
 0x947   :  { %v484_v53 = vsel %vm104_vm2, %v472_v51, %v480_v52 }
 0x948   :  { %v492_v54 = vsel %vm50_vm1, %v484_v53, 0.0  ;;  %v509_v55 = vsel %vm50_vm1, %v484_v53, -inf }
 0x949   :  { %v493_v56 = vrot.slane %v492_v54, 4  ;;  %v510_v57 = vrot.slane %v509_v55, 4 }
 0x94b   :  { %v494_v58 = vadd.f32 %v493_v56, %v492_v54  ;;  %v511_v59 = vmax.f32 %v509_v55, %v510_v57 }
 0x94d   :  { %v495_v60 = vrot.slane %v494_v58, 2  ;;  %v512_v63 = vrot.slane %v511_v59, 2 }
 0x94f   :  { %v496_v4 = vadd.f32 %v495_v60, %v494_v58  ;;  %v513_v7 = vmax.f32 %v511_v59, %v512_v63 }
 0x951   :  { %v497_v10 = vrot.slane %v496_v4, 1  ;;  %v514_v14 = vrot.slane %v513_v7, 1 }
 0x953   :  { %v498_v17 = vadd.f32 %v497_v10, %v496_v4  ;;  %v515_v22 = vmax.f32 %v513_v7, %v514_v14 }
 0x955   :  { %v501_v23 = vmul.f32 0.125, %v498_v17 }
 0x9b5   :  { %v478_v62 = vpop.permute.xlu0 %477 }
 0x9b6   :  { %v483_v0 = vsel %vm104_vm2, %v471_v61, %v478_v62 }
 0x9b7   :  { %v485_v2 = vsel %vm50_vm1, %v483_v0, 0.0  ;;  %v502_v3 = vsel %vm50_vm1, %v483_v0, -inf }
 0x9b8   :  { %v486_v5 = vrot.slane %v485_v2, 4  ;;  %v503_v6 = vrot.slane %v502_v3, 4 }
 0x9ba   :  { %v487_v8 = vadd.f32 %v486_v5, %v485_v2  ;;  %v504_v9 = vmax.f32 %v502_v3, %v503_v6 }
 0x9bc   :  { %v488_v12 = vrot.slane %v487_v8, 2  ;;  %v505_v13 = vrot.slane %v504_v9, 2 }
 0x9be   :  { %v489_v15 = vadd.f32 %v488_v12, %v487_v8  ;;  %v506_v16 = vmax.f32 %v504_v9, %v505_v13 }
 0x9c0   :  { %v490_v18 = vrot.slane %v489_v15, 1  ;;  %v507_v19 = vrot.slane %v506_v16, 1 }
 0x9c2   :  { %v491_v20 = vadd.f32 %v490_v18, %v489_v15  ;;  %v508_v21 = vmax.f32 %v506_v16, %v507_v19 }
 0x9c4   :  { %v500_v24 = vmul.f32 0.125, %v491_v20  ;;  %v523_v25 = vsel %vm518_vm3, %v515_v22, %v508_v21 }
 0x9c5   :  { %524 = vrot.lane.b32.xlu0 %v523_v25, %s787_s18 }
 0x9c6   :  { %v519_v26 = vsel %vm518_vm3, %v501_v23, %v500_v24 }
 0xa37   :  { %v525_v27 = vpop.permute.xlu0 %524 }
 0xa38   :  { %v527_v28 = vsel %vm50_vm1, %v519_v26, %v525_v27 }
 0xa39   :  { %v528_v29 = vpack.c.bf16 %v527_v28, %v527_v28 }
 0xa3b   :  { %704 = vmatmul.mubr.msk.bf16.vlgmr.msra.gmra.mrb[4].mxu0 %vm568_vm4, %v528_v29 }
 0xb0e   :  { %v606_v31 = vpop.f32.mrb[4].mxu0 }
 0xb0f   :  { %v607_v32 = vadd.f32 %v641_v30, %v606_v31  ;;  %v705_v34 = vpop.f32.mrb[5].mxu0 }
 0xb10   :  { %v609_v35 = vpop.f32.mrb[6].mxu0 }
 0xb11   :  { %v706_v36 = vpop.f32.mrb[7].mxu0  ;;  %613 = vst.msk [vmem:[#allocation4] sm:$0x3] %vm612_vm5, %v607_v32 }
 0xb12   :  { %769 = shalt.err (!%p766_p4)
}
 0xb13   :  { %s770_s7 = scalar_lea.hbm %s979_s8, 32 }
 0xb14   :  { %p771_p5 = scmp.ne.s32.totalorder %s979_s8, %s770_s7  ;;  %p774_p6 = scmp.lt.u32.totalorder %s770_s7, %s979_s8 }
 0xb16   :  { %p776_p7 = pnand %p774_p6, %p771_p5 }
 0xb18   :  { %779 = shalt.err (!%p776_p7)
}
 0xb19   :  { %623 = dma.vmem_to_hbm [thread:$0]  %s621_s12, 32, %s979_s8, [#allocation5]  }
 0xb1a   :  { %780 = dma.done.wait [#allocation5], 32  }
 0xb1b   :  { %781 = vsyncadd [#allocation5], 4294967264 }
 0xb1c   :  { %627 = vsyncpa [#allocation5], 1 }

// kernel: forward.5
= control target key start
LH: loop header
LB: loop body
LE: loop exit
PB: predicated region body
PF: predicated region fallthrough
CT: control target
= control target key end

     0   :  { %v1129_v0 = vmov 0.0   ;;  %vm1130_vm0 = vmmov 0   ;;  %vm74_vm1 = vcmask 261120   ;;  %vm126_vm2 = vcmask 130048   ;;  %s1132_s25 = smov 64   ;;  %s1133_s26 = smov 80   ;;  %s1403_s2 = inlined_call_operand.vmem [shape: bf16[32,96], index: 2, kind: input, shape index: {}]   ;;  %s1404_s0 = inlined_call_operand.vmem [shape: f32[16,32], index: 0, kind: input, shape index: {}]   ;;  %s1405_s3 = inlined_call_operand.vmem [shape: f32[1,96], index: 3, kind: input, shape index: {}]   ;;  %s1406_s1 = inlined_call_operand.vmem [shape: f32[2,1,8], index: 1, kind: input, shape index: {}]   ;;  %s1407_s4 = inlined_call_operand.vmem [shape: bf16[32,32], index: 4, kind: input, shape index: {}]   ;;  %s1408_s5 = inlined_call_operand.vmem [shape: f32[1,32], index: 5, kind: input, shape index: {}]   ;;  %s1409_s8 = inlined_call_operand.vmem [shape: bf16[32,64], index: 8, kind: input, shape index: {}]   ;;  %s1410_s6 = inlined_call_operand.vmem [shape: f32[1,32], index: 6, kind: input, shape index: {}]   ;;  %s1411_s7 = inlined_call_operand.vmem [shape: f32[1,32], index: 7, kind: input, shape index: {}]   ;;  %s1412_s10 = inlined_call_operand.vmem [shape: bf16[64,32], index: 10, kind: input, shape index: {}]   ;;  %s1413_s9 = inlined_call_operand.vmem [shape: f32[1,64], index: 9, kind: input, shape index: {}]   ;;  %s1414_s11 = inlined_call_operand.vmem [shape: f32[1,32], index: 11, kind: input, shape index: {}]   ;;  %s1415_s12 = inlined_call_operand.vmem [shape: f32[1,32], index: 12, kind: input, shape index: {}]   ;;  %s1416_s13 = inlined_call_operand.vmem [shape: f32[1,32], index: 13, kind: input, shape index: {}]   ;;  %s1417_s14 = inlined_call_operand.vmem [shape: f32[16,32], index: 14, kind: output, shape index: {}]  }
   0x1   :  { %994 = vmatprep.subr.bf16.mxu0 %v1129_v0  ;;  %v1091_v1 = vld [vmem:[%s1403_s2] sm:$0xff]   ;;  %998 = vmatprep.mubr.msk.bf16.mxu0 %vm1130_vm0, %v1129_v0  ;;  %v1092_v2 = vld [vmem:[%s1403_s2 + $0x8] sm:$0xff]   ;;  %vm238_vm3 = vcmask 64512   ;;  %vm268_vm4 = vcmask 1043456   ;;  %s1135_s27 = smov 48   ;;  %s1136_s16 = smov 16  }
   0x2   :  { %1002 = vmatprep.subr.bf16.mxu1 %v1129_v0  ;;  %1004 = vmatprep.mubr.msk.bf16.mxu1 %vm1130_vm0, %v1129_v0  ;;  %v1227_v3 = vld [vmem:[%s1404_s0] sm:$0xff]  ;;  %v1232_v4 = vld [vmem:[%s1404_s0 + $0x8] sm:$0xff]  ;;  %s1131_s0 = smov 96   ;;  %vm835_vm5 = vcmask 523264  }
   0x3   :  { %995 = vmatpush3.bf16.msra.mxu0 %v1091_v1  ;;  %v50_v5 = vpack.c.bf16 %v1232_v4, %v1227_v3  ;;  %v932_v6 = vld [vmem:[%s1405_s3] ss:$0 sm:$0xff]  ;;  %v1271_v27 = vld [vmem:[%s1406_s1 + $0x1] ss:$0 sm:$0xff] }
   0x4   :  { %996 = vmatprep.subr.bf16.mxu0 %v1129_v0  ;;  %v1265_v20 = vld [vmem:[%s1406_s1] ss:$0 sm:$0xff]  ;;  %s1134_s1 = smov 112  }
   0x7   :  { %997 = vmatpush3.bf16.msra.mxu0 %v1092_v2 }
   0x8   :  { %1008 = vmatprep.subr.bf16.mxu0 %v1129_v0 }
   0xa   :  { %999 = vmatmul.mubr.msk.bf16.vlgmr.msra.gmra.mrb[0].mxu0 %vm74_vm1, %v50_v5 }
   0xb   :  { %1010 = vmatprep.mubr.msk.bf16.mxu0 %vm1130_vm0, %v1129_v0 }
  0xdd   :  { %v112_v7 = vpop.f32.mrb[0].mxu0 }
  0xde   :  { %v113_v8 = vadd.f32 %v932_v6, %v112_v7  ;;  %v1000_v9 = vpop.f32.mrb[1].mxu0 }
  0xdf   :  { %v115_v10 = vpop.f32.mrb[2].mxu0 }
  0xe0   :  { %v1244_v11 = vpack.c.bf16 %v113_v8, %v113_v8  ;;  %v116_v12 = vadd.f32 %v932_v6, %v115_v10  ;;  %v1001_v13 = vpop.f32.mrb[3].mxu0 }
  0xe2   :  { %124 = vrot.lane.b32.xlu0 %v1244_v11, %s1131_s0  ;;  %v1247_v14 = vpack.c.bf16 %v116_v12, %v116_v12 }
  0xe6   :  { %174 = vrot.lane.b32.xlu0 %v1247_v14, %s1131_s0 }
 0x154   :  { %v125_v15 = vpop.permute.xlu0 %124 }
 0x155   :  { %v131_v16 = vsel %vm126_vm2, %v125_v15, 0 }
 0x156   :  { %1003 = vmatpush3.bf16.xpose.msra.mxu1 %v131_v16 }
 0x157   :  { %1014 = vmatprep.subr.bf16.mxu1 %v1129_v0 }
 0x158   :  { %v175_v17 = vpop.permute.xlu0 %174 }
 0x159   :  { %v180_v18 = vsel %vm126_vm2, %v175_v17, 0 }
 0x15a   :  { %1009 = vmatpush3.bf16.xpose.msra.mxu0 %v180_v18 }
 0x15b   :  { %1020 = vmatprep.subr.bf16.mxu0 %v1129_v0 }
 0x15d   :  { %1005 = vmatmul.mubr.msk.bf16.vlgmr.msra.gmra.mrb[0].mxu1 %vm126_vm2, %v1244_v11 }
 0x15e   :  { %1016 = vmatprep.mubr.msk.bf16.mxu1 %vm1130_vm0, %v1129_v0 }
 0x161   :  { %1011 = vmatmul.mubr.msk.bf16.vlgmr.msra.gmra.mrb[4].mxu0 %vm126_vm2, %v1247_v14 }
 0x162   :  { %1022 = vmatprep.mubr.msk.bf16.mxu0 %vm1130_vm0, %v1129_v0 }
 0x230   :  { %v167_v19 = vpop.f32.mrb[0].mxu1 }
 0x231   :  { %v222_v21 = vmul.f32 0.25, %v167_v19  ;;  %v1006_v22 = vpop.f32.mrb[1].mxu1 }
 0x232   :  { %v170_v23 = vpop.f32.mrb[2].mxu1 }
 0x233   :  { %v1007_v24 = vpop.f32.mrb[3].mxu1  ;;  %v236_v25 = vadd.f32 %v1265_v20, %v222_v21 }
 0x234   :  { %v216_v26 = vpop.f32.mrb[4].mxu0 }
 0x235   :  { %v223_v28 = vmul.f32 0.25, %v216_v26  ;;  %v1012_v29 = vpop.f32.mrb[5].mxu0  ;;  %v239_v30 = vsel %vm238_vm3, %v236_v25, -inf }
 0x236   :  { %240 = vmax.xlane.f32.xlu1 %v239_v30  ;;  %v219_v31 = vpop.f32.mrb[6].mxu0 }
 0x237   :  { %v1013_v32 = vpop.f32.mrb[7].mxu0  ;;  %v237_v33 = vadd.f32 %v1271_v27, %v223_v28 }
 0x239   :  { %v242_v34 = vsel %vm238_vm3, %v237_v33, -inf }
 0x23a   :  { %243 = vmax.xlane.f32.xlu1 %v242_v34 }
 0x24b   :  { %263 = vrot.lane.b32.xlu1 %v1244_v11, %s1132_s25 }
 0x24f   :  { %312 = vrot.lane.b32.xlu1 %v1247_v14, %s1132_s25 }
 0x253   :  { %362 = vrot.lane.b32.xlu1 %v1244_v11, %s1133_s26 }
 0x2c3   :  { %v241_v35 = vpop.xlane.xlu1 %240 }
 0x2c4   :  { %v245_v36 = vsub.f32 %v236_v25, %v241_v35 }
 0x2c6   :  { %v247_v37 = vmul.f32 1.442695, %v245_v36 }
 0x2c7   :  { %v244_v38 = vpop.xlane.xlu1 %243 }
 0x2c8   :  { %1101 = vpow2.f32 %v247_v37  ;;  %v246_v39 = vsub.f32 %v237_v33, %v244_v38 }
 0x2ca   :  { %v249_v40 = vmul.f32 1.442695, %v246_v39 }
 0x2cb   :  { %v264_v41 = vpop.permute.xlu1 %263 }
 0x2cc   :  { %1103 = vpow2.f32 %v249_v40  ;;  %v270_v42 = vsel %vm268_vm4, %v264_v41, 0 }
 0x2cd   :  { %1015 = vmatpush3.bf16.msra.mxu1 %v270_v42 }
 0x2ce   :  { %1026 = vmatprep.subr.bf16.mxu1 %v1129_v0 }
 0x2cf   :  { %v313_v43 = vpop.permute.xlu1 %312 }
 0x2d0   :  { %v318_v44 = vsel %vm268_vm4, %v313_v43, 0 }
 0x2d1   :  { %1021 = vmatpush3.bf16.msra.mxu0 %v318_v44 }
 0x2d2   :  { %v1102_v45 = vpop.eup %1101  ;;  %1032 = vmatprep.subr.bf16.mxu0 %v1129_v0 }
 0x2d3   :  { %v251_v46 = vsel %vm238_vm3, %v1102_v45, 0.0  ;;  %v363_v49 = vpop.permute.xlu1 %362 }
 0x2d4   :  { %252 = vadd.xlane.f32.xlu0 %v251_v46  ;;  %v368_v56 = vsel %vm126_vm2, %v363_v49, 0  ;;  %v1093_v46 = vld [vmem:[%s1407_s4] sm:$0xff]  }
 0x2d6   :  { %v1104_v47 = vpop.eup %1103 }
 0x2d7   :  { %v254_v48 = vsel %vm238_vm3, %v1104_v47, 0.0 }
 0x2d8   :  { %255 = vadd.xlane.f32.xlu1 %v254_v48 }
 0x2e9   :  { %412 = vrot.lane.b32.xlu1 %v1247_v14, %s1133_s26 }
 0x2ea   :  { %360 = vrot.lane.b32.xlu0 %v1244_v11, %s1134_s1 }
 0x2ed   :  { %410 = vrot.lane.b32.xlu1 %v1247_v14, %s1134_s1 }
 0x361   :  { %v253_v50 = vpop.xlane.xlu0 %252 }
 0x362   :  { %1105 = vrcp.f32 %v253_v50 }
 0x365   :  { %v256_v51 = vpop.xlane.xlu1 %255  ;;  %v361_v61 = vpop.permute.xlu0 %360 }
 0x366   :  { %1107 = vrcp.f32 %v256_v51 }
 0x369   :  { %v413_v58 = vpop.permute.xlu1 %412 }
 0x36a   :  { %v418_v60 = vsel %vm126_vm2, %v413_v58, 0 }
 0x36c   :  { %v1106_v52 = vpop.eup %1105 }
 0x36d   :  { %v258_v53 = vmul.f32 %v1106_v52, %v1102_v45  ;;  %v411_v62 = vpop.permute.xlu1 %410 }
 0x36f   :  { %v261_v54 = vpack.c.bf16 %v258_v53, %v258_v53 }
 0x370   :  { %v1108_v55 = vpop.eup %1107 }
 0x371   :  { %v260_v57 = vmul.f32 %v1108_v55, %v1104_v47  ;;  %1017 = vmatmul.mubr.msk.bf16.vlgmr.msra.gmra.mrb[4].mxu1 %vm238_vm3, %v261_v54  ;;  %v1094_v47 = vld [vmem:[%s1407_s4 + $0x8] sm:$0xff]  }
 0x372   :  { %1027 = vmatpush3.bf16.xpose.msra.mxu1 %v368_v56  ;;  %1028 = vmatprep.mubr.msk.bf16.mxu1 %vm1130_vm0, %v1129_v0 }
 0x373   :  { %v262_v59 = vpack.c.bf16 %v260_v57, %v260_v57  ;;  %1038 = vmatprep.subr.bf16.mxu1 %v1129_v0 }
 0x375   :  { %1023 = vmatmul.mubr.msk.bf16.vlgmr.msra.gmra.mrb[8].mxu0 %vm238_vm3, %v262_v59 }
 0x376   :  { %1033 = vmatpush3.bf16.xpose.msra.mxu0 %v418_v60  ;;  %1034 = vmatprep.mubr.msk.bf16.mxu0 %vm1130_vm0, %v1129_v0 }
 0x377   :  { %1044 = vmatprep.subr.bf16.mxu0 %v1129_v0 }
 0x379   :  { %1029 = vmatmul.mubr.msk.bf16.vlgmr.msra.gmra.mrb[8].mxu1 %vm126_vm2, %v361_v61 }
 0x37a   :  { %1040 = vmatprep.mubr.msk.bf16.mxu1 %vm1130_vm0, %v1129_v0 }
 0x37d   :  { %1035 = vmatmul.mubr.msk.bf16.vlgmr.msra.gmra.mrb[12].mxu0 %vm126_vm2, %v411_v62 }
 0x37e   :  { %1046 = vmatprep.mubr.msk.bf16.mxu0 %vm1130_vm0, %v1129_v0 }
 0x444   :  { %v1304_v63 = vpop.f32.mrb[4].mxu1 }
 0x445   :  { %v1018_v1 = vpop.f32.mrb[5].mxu1 }
 0x446   :  { %v309_v2 = vpop.f32.mrb[6].mxu1  ;;  %v946_v1 = vld [vmem:[%s1408_s5] ss:$0 sm:$0xff] }
 0x447   :  { %v1019_v5 = vpop.f32.mrb[7].mxu1 }
 0x448   :  { %v1306_v6 = vpop.f32.mrb[8].mxu0 }
 0x449   :  { %v1024_v7 = vpop.f32.mrb[9].mxu0 }
 0x44a   :  { %v357_v8 = vpop.f32.mrb[10].mxu0 }
 0x44b   :  { %v1025_v9 = vpop.f32.mrb[11].mxu0 }
 0x44c   :  { %v404_v10 = vpop.f32.mrb[8].mxu1 }
 0x44d   :  { %v460_v12 = vmul.f32 0.25, %v404_v10  ;;  %v1030_v13 = vpop.f32.mrb[9].mxu1 }
 0x44e   :  { %v407_v15 = vpop.f32.mrb[10].mxu1 }
 0x44f   :  { %v1031_v16 = vpop.f32.mrb[11].mxu1  ;;  %v462_v17 = vadd.f32 %v1265_v20, %v460_v12 }
 0x450   :  { %v454_v18 = vpop.f32.mrb[12].mxu0 }
 0x451   :  { %v461_v19 = vmul.f32 0.25, %v454_v18  ;;  %v1036_v21 = vpop.f32.mrb[13].mxu0  ;;  %v464_v22 = vsel %vm238_vm3, %v462_v17, -inf }
 0x452   :  { %465 = vmax.xlane.f32.xlu1 %v464_v22  ;;  %v457_v23 = vpop.f32.mrb[14].mxu0 }
 0x453   :  { %v1037_v24 = vpop.f32.mrb[15].mxu0  ;;  %v463_v25 = vadd.f32 %v1271_v27, %v461_v19 }
 0x455   :  { %v467_v26 = vsel %vm238_vm3, %v463_v25, -inf }
 0x456   :  { %468 = vmax.xlane.f32.xlu0 %v467_v26 }
 0x46c   :  { %536 = vrot.lane.b32.xlu0 %v1247_v14, %s1135_s27 }
 0x4df   :  { %v466_v28 = vpop.xlane.xlu1 %465 }
 0x4e0   :  { %v470_v29 = vsub.f32 %v462_v17, %v466_v28 }
 0x4e2   :  { %v472_v30 = vmul.f32 1.442695, %v470_v29 }
 0x4e3   :  { %v469_v20 = vpop.xlane.xlu0 %468 }
 0x4e4   :  { %1109 = vpow2.f32 %v472_v30  ;;  %v471_v31 = vsub.f32 %v463_v25, %v469_v20  ;;  %v1096_v25 = vld [vmem:[%s1409_s8 + $0x8] sm:$0xff]  }
 0x4e6   :  { %v474_v32 = vmul.f32 1.442695, %v471_v31 }
 0x4e7   :  { %v537_v33 = vpop.permute.xlu0 %536 }
 0x4e8   :  { %1111 = vpow2.f32 %v474_v32  ;;  %v542_v34 = vsel %vm268_vm4, %v537_v33, 0  ;;  %v950_v33 = vld [vmem:[%s1410_s6] ss:$0 sm:$0xff] }
 0x4e9   :  { %1045 = vmatpush3.bf16.msra.mxu0 %v542_v34 }
 0x4ea   :  { %1058 = vmatprep.subr.bf16.mxu0 %v1129_v0 }
 0x4ee   :  { %v1110_v27 = vpop.eup %1109 }
 0x4ef   :  { %v476_v35 = vsel %vm238_vm3, %v1110_v27, 0.0 }
 0x4f0   :  { %477 = vadd.xlane.f32.xlu1 %v476_v35 }
 0x4f2   :  { %v1112_v36 = vpop.eup %1111 }
 0x4f3   :  { %v479_v14 = vsel %vm238_vm3, %v1112_v36, 0.0 }
 0x4f4   :  { %480 = vadd.xlane.f32.xlu1 %v479_v14  ;;  %v951_v14 = vld [vmem:[%s1411_s7] ss:$0 sm:$0xff] }
 0x505   :  { %488 = vrot.lane.b32.xlu1 %v1244_v11, %s1135_s27 }
 0x57d   :  { %v478_v37 = vpop.xlane.xlu1 %477 }
 0x57e   :  { %1113 = vrcp.f32 %v478_v37 }
 0x581   :  { %v481_v38 = vpop.xlane.xlu1 %480 }
 0x582   :  { %1115 = vrcp.f32 %v481_v38 }
 0x585   :  { %v489_v39 = vpop.permute.xlu1 %488 }
 0x586   :  { %v494_v40 = vsel %vm268_vm4, %v489_v39, 0 }
 0x587   :  { %1039 = vmatpush3.bf16.msra.mxu1 %v494_v40 }
 0x588   :  { %v1114_v41 = vpop.eup %1113  ;;  %1050 = vmatprep.subr.bf16.mxu1 %v1129_v0 }
 0x589   :  { %v483_v42 = vmul.f32 %v1114_v41, %v1110_v27  ;;  %v1097_v41 = vld [vmem:[%s1412_s10] sm:$0xff]  }
 0x58b   :  { %v486_v43 = vpack.c.bf16 %v483_v42, %v483_v42  ;;  %v1098_v42 = vld [vmem:[%s1412_s10 + $0x8] sm:$0xff]  }
 0x58c   :  { %v1116_v44 = vpop.eup %1115 }
 0x58d   :  { %v485_v45 = vmul.f32 %v1116_v44, %v1112_v36  ;;  %1041 = vmatmul.mubr.msk.bf16.vlgmr.msra.gmra.mrb[12].mxu1 %vm238_vm3, %v486_v43  ;;  %v1099_v43 = vld [vmem:[%s1412_s10 + $0x10] sm:$0xff]   ;;  %v1100_v44 = vld [vmem:[%s1412_s10 + $0x18] sm:$0xff]  }
 0x58e   :  { %1054 = vmatprep.mubr.msk.bf16.mxu1 %vm1130_vm0, %v1129_v0  ;;  %1051 = vmatpush3.bf16.msra.mxu1 %v1093_v46 }
 0x58f   :  { %v487_v11 = vpack.c.bf16 %v485_v45, %v485_v45  ;;  %1052 = vmatprep.subr.bf16.mxu1 %v1129_v0  ;;  %v952_v45 = vld [vmem:[%s1413_s9] ss:$0 sm:$0xff] }
 0x591   :  { %1047 = vmatmul.mubr.msk.bf16.vlgmr.msra.gmra.mrb[16].mxu0 %vm238_vm3, %v487_v11 }
 0x592   :  { %1062 = vmatprep.mubr.msk.bf16.mxu0 %vm1130_vm0, %v1129_v0  ;;  %1053 = vmatpush3.bf16.msra.mxu1 %v1094_v47 }
 0x593   :  { %1066 = vmatprep.subr.bf16.mxu1 %v1129_v0 }
 0x660   :  { %v530_v48 = vpop.f32.mrb[12].mxu1 }
 0x661   :  { %v1042_v49 = vpop.f32.mrb[13].mxu1 }
 0x662   :  { %v533_v50 = vpop.f32.mrb[14].mxu1 }
 0x663   :  { %v1043_v51 = vpop.f32.mrb[15].mxu1 }
 0x664   :  { %v578_v52 = vpop.f32.mrb[16].mxu0 }
 0x665   :  { %v1086_v53 = vpack.i.bf16 %v578_v52, %v530_v48  ;;  %v1048_v54 = vpop.f32.mrb[17].mxu0 }
 0x666   :  { %v581_v55 = vpop.f32.mrb[18].mxu0 }
 0x667   :  { %1087 = vrot.lane.b32.xlu1 %v1086_v53, %s1136_s16  ;;  %v1049_v56 = vpop.f32.mrb[19].mxu0 }
 0x6d9   :  { %v1088_v57 = vpop.permute.xlu1 %1087 }
 0x6da   :  { %v1090_v58 = vunpack.i.h.bf16 %v1088_v57  ;;  %v1089_v59 = vunpack.i.l.bf16 %v1088_v57 }
 0x6dc   :  { %v593_v60 = vsel %vm126_vm2, %v1306_v6, %v1090_v58  ;;  %v592_v61 = vsel %vm126_vm2, %v1304_v63, %v1089_v59 }
 0x6dd   :  { %v594_v62 = vpack.c.bf16 %v593_v60, %v592_v61 }
 0x6df   :  { %1055 = vmatmul.mubr.msk.bf16.vlgmr.msra.gmra.mrb[16].mxu1 %vm74_vm1, %v594_v62 }
 0x6e0   :  { %1074 = vmatprep.mubr.msk.bf16.mxu1 %vm1130_vm0, %v1129_v0  ;;  %1067 = vmatpush3.bf16.msra.mxu1 %v1097_v41 }
 0x6e1   :  { %1068 = vmatprep.subr.bf16.mxu1 %v1129_v0 }
 0x6e4   :  { %1069 = vmatpush3.bf16.msra.mxu1 %v1098_v42 }
 0x6e5   :  { %1070 = vmatprep.subr.bf16.mxu1 %v1129_v0 }
 0x6e8   :  { %1071 = vmatpush3.bf16.msra.mxu1 %v1099_v43 }
 0x6e9   :  { %1072 = vmatprep.subr.bf16.mxu1 %v1129_v0 }
 0x6ec   :  { %1073 = vmatpush3.bf16.msra.mxu1 %v1100_v44 }
 0x7b2   :  { %v655_v2 = vpop.f32.mrb[16].mxu1 }
 0x7b3   :  { %v656_v5 = vadd.f32 %v946_v1, %v655_v2  ;;  %v1056_v7 = vpop.f32.mrb[17].mxu1 }
 0x7b4   :  { %v658_v8 = vpop.f32.mrb[18].mxu1 }
 0x7b5   :  { %v659_v9 = vadd.f32 %v946_v1, %v658_v8  ;;  %v1057_v10 = vpop.f32.mrb[19].mxu1  ;;  %v662_v6 = vadd.f32 %v656_v5, %v1227_v3 }
 0x7b6   :  { %v956_v10 = vld [vmem:[%s1414_s11] ss:$0 sm:$0xff] }
 0x7b7   :  { %v666_v63 = vsel %vm74_vm1, %v662_v6, 0.0  ;;  %v663_v12 = vadd.f32 %v659_v9, %v1232_v4  ;;  %v1095_v4 = vld [vmem:[%s1409_s8] sm:$0xff]  }
 0x7b8   :  { %667 = vadd.xlane.f32.xlu1 %v666_v63  ;;  %1059 = vmatpush3.bf16.msra.mxu0 %v1095_v4 }
 0x7b9   :  { %v669_v13 = vsel %vm74_vm1, %v663_v12, 0.0  ;;  %1060 = vmatprep.subr.bf16.mxu0 %v1129_v0 }
 0x7ba   :  { %670 = vadd.xlane.f32.xlu0 %v669_v13 }
 0x7bc   :  { %1061 = vmatpush3.bf16.msra.mxu0 %v1096_v25 }
 0x845   :  { %v668_v15 = vpop.xlane.xlu1 %667 }
 0x846   :  { %v673_v16 = vmul.f32 0.03125, %v668_v15 }
 0x847   :  { %v671_v17 = vpop.xlane.xlu0 %670 }
 0x848   :  { %v675_v18 = vsub.f32 %v662_v6, %v673_v16  ;;  %v674_v19 = vmul.f32 0.03125, %v671_v17 }
 0x84a   :  { %v676_v21 = vsub.f32 %v663_v12, %v674_v19  ;;  %v677_v22 = vmul.f32 %v675_v18, %v675_v18 }
 0x84c   :  { %v679_v23 = vsel %vm74_vm1, %v677_v22, 0.0  ;;  %v678_v24 = vmul.f32 %v676_v21, %v676_v21 }
 0x84d   :  { %680 = vadd.xlane.f32.xlu0 %v679_v23 }
 0x84e   :  { %v682_v3 = vsel %vm74_vm1, %v678_v24, 0.0 }
 0x84f   :  { %683 = vadd.xlane.f32.xlu1 %v682_v3 }
 0x8da   :  { %v681_v26 = vpop.xlane.xlu0 %680 }
 0x8db   :  { %v685_v28 = vmul.f32 0.03125, %v681_v26 }
 0x8dc   :  { %v684_v29 = vpop.xlane.xlu1 %683 }
 0x8dd   :  { %v687_v30 = vadd.f32 1e-12, %v685_v28  ;;  %v686_v20 = vmul.f32 0.03125, %v684_v29 }
 0x8df   :  { %1117 = vrsqrt.f32 %v687_v30  ;;  %v688_v31 = vadd.f32 1e-12, %v686_v20 }
 0x8e1   :  { %1119 = vrsqrt.f32 %v688_v31 }
 0x8e9   :  { %v1118_v32 = vpop.eup %1117 }
 0x8ea   :  { %v691_v34 = vmul.f32 %v1118_v32, %v675_v18 }
 0x8eb   :  { %v1120_v27 = vpop.eup %1119 }
 0x8ec   :  { %v699_v35 = vmul.f32 %v950_v33, %v691_v34  ;;  %v692_v36 = vmul.f32 %v1120_v27, %v676_v21 }
 0x8ee   :  { %v700_v37 = vmul.f32 %v950_v33, %v692_v36  ;;  %v707_v38 = vadd.f32 %v951_v14, %v699_v35  ;;  %v962_v36 = vld [vmem:[%s1415_s12] ss:$0 sm:$0xff] }
 0x8f0   :  { %v708_v39 = vadd.f32 %v951_v14, %v700_v37 }
 0x8f2   :  { %v709_v40 = vpack.c.bf16 %v708_v39, %v707_v38 }
 0x8f4   :  { %1063 = vmatmul.mubr.msk.bf16.vlgmr.msra.gmra.mrb[20].mxu0 %vm74_vm1, %v709_v40 }
 0x9c7   :  { %v770_v11 = vpop.f32.mrb[20].mxu0 }
 0x9c8   :  { %v771_v46 = vadd.f32 %v952_v45, %v770_v11  ;;  %v1064_v47 = vpop.f32.mrb[21].mxu0 }
 0x9c9   :  { %v773_v48 = vpop.f32.mrb[22].mxu0 }
 0x9ca   :  { %v777_v49 = vmul.f32 %v771_v46, %v771_v46  ;;  %v774_v50 = vadd.f32 %v952_v45, %v773_v48  ;;  %v1065_v51 = vpop.f32.mrb[23].mxu0 }
 0x9cc   :  { %v779_v52 = vmul.f32 %v777_v49, %v771_v46  ;;  %v778_v53 = vmul.f32 %v774_v50, %v774_v50 }
 0x9ce   :  { %v781_v54 = vmul.f32 0.044715, %v779_v52  ;;  %v780_v0 = vmul.f32 %v778_v53, %v774_v50 }
 0x9d0   :  { %v783_v55 = vadd.f32 %v781_v54, %v771_v46  ;;  %v782_v56 = vmul.f32 0.044715, %v780_v0 }
 0x9d2   :  { %v785_v57 = vmul.f32 0.7978846, %v783_v55  ;;  %v784_v58 = vadd.f32 %v782_v56, %v774_v50 }
 0x9d4   :  { %1121 = vtanh.f32 %v785_v57  ;;  %v786_v59 = vmul.f32 0.7978846, %v784_v58 }
 0x9d6   :  { %1123 = vtanh.f32 %v786_v59 }
 0x9de   :  { %v1122_v60 = vpop.eup %1121 }
 0x9df   :  { %v789_v61 = vadd.f32 1.0, %v1122_v60 }
 0x9e0   :  { %v1124_v62 = vpop.eup %1123 }
 0x9e1   :  { %v791_v1 = vmul.f32 0.5, %v789_v61  ;;  %v790_v2 = vadd.f32 1.0, %v1124_v62 }
 0x9e3   :  { %v792_v5 = vmul.f32 0.5, %v790_v2  ;;  %v793_v7 = vmul.f32 %v791_v1, %v771_v46 }
 0x9e5   :  { %v794_v8 = vmul.f32 %v792_v5, %v774_v50 }
 0x9e7   :  { %v795_v9 = vpack.c.bf16 %v794_v8, %v793_v7 }
 0x9e9   :  { %1075 = vmatmul.mubr.msk.bf16.vlgmr.msra.gmra.mrb[20].mxu1 %vm835_vm5, %v795_v9 }
 0xabc   :  { %v873_v6 = vpop.f32.mrb[20].mxu1 }
 0xabd   :  { %v874_v63 = vadd.f32 %v956_v10, %v873_v6  ;;  %v1076_v12 = vpop.f32.mrb[21].mxu1 }
 0xabe   :  { %v876_v13 = vpop.f32.mrb[22].mxu1 }
 0xabf   :  { %v877_v15 = vadd.f32 %v956_v10, %v876_v13  ;;  %v1077_v16 = vpop.f32.mrb[23].mxu1  ;;  %v880_v17 = vadd.f32 %v874_v63, %v707_v38  ;;  %v963_v38 = vld [vmem:[%s1416_s13] ss:$0 sm:$0xff] }
 0xac1   :  { %v884_v18 = vsel %vm74_vm1, %v880_v17, 0.0  ;;  %v881_v19 = vadd.f32 %v877_v15, %v708_v39 }
 0xac2   :  { %885 = vadd.xlane.f32.xlu0 %v884_v18 }
 0xac3   :  { %v887_v21 = vsel %vm74_vm1, %v881_v19, 0.0 }
 0xac4   :  { %888 = vadd.xlane.f32.xlu1 %v887_v21 }
 0xb4f   :  { %v886_v22 = vpop.xlane.xlu0 %885 }
 0xb50   :  { %v890_v23 = vmul.f32 0.03125, %v886_v22 }
 0xb51   :  { %v889_v24 = vpop.xlane.xlu1 %888 }
 0xb52   :  { %v892_v3 = vsub.f32 %v880_v17, %v890_v23  ;;  %v891_v4 = vmul.f32 0.03125, %v889_v24 }
 0xb54   :  { %v893_v25 = vsub.f32 %v881_v19, %v891_v4  ;;  %v894_v26 = vmul.f32 %v892_v3, %v892_v3 }
 0xb56   :  { %v896_v28 = vsel %vm74_vm1, %v894_v26, 0.0  ;;  %v895_v29 = vmul.f32 %v893_v25, %v893_v25 }
 0xb57   :  { %897 = vadd.xlane.f32.xlu0 %v896_v28 }
 0xb58   :  { %v899_v30 = vsel %vm74_vm1, %v895_v29, 0.0 }
 0xb59   :  { %900 = vadd.xlane.f32.xlu1 %v899_v30 }
 0xbe4   :  { %v898_v20 = vpop.xlane.xlu0 %897 }
 0xbe5   :  { %v902_v31 = vmul.f32 0.03125, %v898_v20 }
 0xbe6   :  { %v901_v32 = vpop.xlane.xlu1 %900 }
 0xbe7   :  { %v904_v33 = vadd.f32 1e-12, %v902_v31  ;;  %v903_v34 = vmul.f32 0.03125, %v901_v32 }
 0xbe9   :  { %1125 = vrsqrt.f32 %v904_v33  ;;  %v905_v27 = vadd.f32 1e-12, %v903_v34 }
 0xbeb   :  { %1127 = vrsqrt.f32 %v905_v27 }
 0xbf3   :  { %v1126_v35 = vpop.eup %1125 }
 0xbf4   :  { %v908_v14 = vmul.f32 %v1126_v35, %v892_v3 }
 0xbf5   :  { %v1128_v37 = vpop.eup %1127 }
 0xbf6   :  { %v916_v39 = vmul.f32 %v962_v36, %v908_v14  ;;  %v909_v40 = vmul.f32 %v1128_v37, %v893_v25 }
 0xbf8   :  { %v924_v41 = vadd.f32 %v963_v38, %v916_v39  ;;  %v917_v42 = vmul.f32 %v962_v36, %v909_v40 }
 0xbfa   :  { %926 = vst.msk [vmem:[%s1417_s14] sm:$0xff] %vm74_vm1, %v924_v41  ;;  %v925_v43 = vadd.f32 %v963_v38, %v917_v42 }
 0xbfc   :  { %927 = vst.msk [vmem:[%s1417_s14 + $0x8] sm:$0xff] %vm74_vm1, %v925_v43 }

</bundles_post_ra>
